<compile_context>
chip_gen: v6e
topology: v6e:2x2x1
jax: 0.10.0
libtpu: 0.0.40
codegen_flags: <defaults>
</compile_context>

<pallas_src>
import functools

import jax
import jax.numpy as jnp
from jax import lax
from jax.experimental import pallas as pl
from jax.experimental.pallas import tpu as pltpu


# ----------------------------------------------------------------------------
# Tiling helpers
# ----------------------------------------------------------------------------
def _choose_groups_per_pack(G, d, max_lane=256):
    """Number of groups packed per lane-dense column slab (Pd = P * d)."""
    D = G * d
    if D <= max_lane:
        return G                                   # single pack == full D
    divisors = [p for p in range(1, G + 1) if G % p == 0]
    aligned = [p for p in divisors if (p * d) % 128 == 0 and p * d <= max_lane]
    if aligned:
        return max(aligned)
    # No 128-aligned pack exists: fall back to a single pack over all of D
    # (a full-extent last dim is always a legal BlockSpec).
    return G


def _choose_batch_tile(B, pack_width, vmem_budget_bytes=4 << 20, max_rows=1024):
    """Largest batch tile dividing B, multiple of 8, within a VMEM budget.

    Bigger tiles amortize the ~0.35us per-grid-step overhead and get closer to
    the HBM roofline; the budget keeps a (TB, Pd) fp32 block comfortably inside
    the double-buffered VMEM window of both kernels.
    """
    cap = min(max_rows, max(8, vmem_budget_bytes // (pack_width * 4)))
    if B <= cap:
        return B                                   # full extent is always legal
    cap -= cap % 8
    for t in range(cap, 7, -8):
        if B % t == 0:
            return t
    return B


# ----------------------------------------------------------------------------
# Kernel 1: per-(sub-batch, pack) column sum + raw second moment (batch-tiled)
# ----------------------------------------------------------------------------
def _moments_kernel(x_ref, sum_ref, ssq_ref):
    @pl.when(pl.program_id(2) == 0)
    def _():
        sum_ref[...] = jnp.zeros_like(sum_ref)
        ssq_ref[...] = jnp.zeros_like(ssq_ref)

    x = x_ref[0].astype(jnp.float32)                       # (TB, Pd)
    # Column sums: cross-sublane reduce goes to the XLU slot (free vs the MXU).
    sum_ref[0, 0] += jnp.sum(x, axis=0, keepdims=True)
    # x^T x without an explicit transpose: contract the batch (sublane) axis.
    ssq_ref[0, 0] += lax.dot_general(
        x, x,
        dimension_numbers=(((0,), (0,)), ((), ())),
        preferred_element_type=jnp.float32)


def group_moments(x_sh, pack_width, batch_tile):
    """x_sh: (3, B, D) -> sum_x (3, n_packs, 1, Pd), sum_xxT (3, n_packs, Pd, Pd)."""
    three, B, D = x_sh.shape
    n_packs = D // pack_width
    n_bt = B // batch_tile
    flops = 2 * three * n_packs * B * pack_width * pack_width
    bytes_accessed = (three * B * D
                      + three * n_packs * (pack_width + pack_width ** 2)) * 4
    return pl.pallas_call(
        _moments_kernel,
        out_shape=(
            jax.ShapeDtypeStruct((three, n_packs, 1, pack_width), jnp.float32),
            jax.ShapeDtypeStruct((three, n_packs, pack_width, pack_width),
                                 jnp.float32),
        ),
        grid=(three, n_packs, n_bt),
        in_specs=[pl.BlockSpec((1, batch_tile, pack_width),
                               lambda s, n, bt: (s, bt, n))],
        out_specs=(
            pl.BlockSpec((1, 1, 1, pack_width), lambda s, n, bt: (s, n, 0, 0)),
            pl.BlockSpec((1, 1, pack_width, pack_width),
                         lambda s, n, bt: (s, n, 0, 0)),
        ),
        compiler_params=pltpu.CompilerParams(
            dimension_semantics=("parallel", "parallel", "arbitrary"),
            vmem_limit_bytes=32 * 1024 * 1024),
        cost_estimate=pl.CostEstimate(flops=flops, transcendentals=0,
                                      bytes_accessed=bytes_accessed),
    )(x_sh)


# ----------------------------------------------------------------------------
# Kernel 2: fused centering + whitening  y = x @ W_blk - mean @ W_blk
# ----------------------------------------------------------------------------
def _apply_kernel(x_ref, w_ref, b_ref, o_ref, *, matmul_dtype):
    x = x_ref[0].astype(matmul_dtype)                      # (TB, Pd)
    w = w_ref[0, 0].astype(matmul_dtype)                   # (Pd, Pd) block-diag
    y = jnp.dot(x, w, preferred_element_type=jnp.float32)
    o_ref[0] = (y - b_ref[0, 0]).astype(o_ref.dtype)


def whiten_apply(x_sh, w_blk, bias, batch_tile, matmul_dtype=jnp.float32):
    """x_sh (3,B,D), w_blk (3,n_packs,Pd,Pd), bias (3,n_packs,1,Pd) -> (3,B,D)."""
    three, B, D = x_sh.shape
    n_packs, pack_width = w_blk.shape[1], w_blk.shape[-1]
    n_bt = B // batch_tile
    kernel = functools.partial(_apply_kernel, matmul_dtype=matmul_dtype)
    flops = 2 * three * n_packs * B * pack_width * pack_width
    bytes_accessed = (2 * three * B * D
                      + three * n_packs * (pack_width ** 2 + pack_width)) * 4
    # NOTE: with the batch-tile axis innermost, the W / bias block indices are
    # unchanged across consecutive steps, so Pallas does not re-DMA them.
    return pl.pallas_call(
        kernel,
        out_shape=jax.ShapeDtypeStruct((three, B, D), jnp.float32),
        grid=(three, n_packs, n_bt),
        in_specs=[
            pl.BlockSpec((1, batch_tile, pack_width),
                         lambda s, n, bt: (s, bt, n)),
            pl.BlockSpec((1, 1, pack_width, pack_width),
                         lambda s, n, bt: (s, n, 0, 0)),
            pl.BlockSpec((1, 1, 1, pack_width), lambda s, n, bt: (s, n, 0, 0)),
        ],
        out_specs=pl.BlockSpec((1, batch_tile, pack_width),
                               lambda s, n, bt: (s, bt, n)),
        compiler_params=pltpu.CompilerParams(
            dimension_semantics=("parallel", "parallel", "parallel"),
            vmem_limit_bytes=32 * 1024 * 1024),
        cost_estimate=pl.CostEstimate(flops=flops, transcendentals=0,
                                      bytes_accessed=bytes_accessed),
    )(x_sh, w_blk, bias)


# ----------------------------------------------------------------------------
# Glue: transformation() equivalent (engine='symeig', W = U S^{-1/2} U^T)
# ----------------------------------------------------------------------------
def _whitening_matrices(covs, eps=1e-12):
    # covs: (K, d, d) symmetric PSD.  eps-clamp guards near-singular groups
    # (e.g. batch < d); it is far below realistic eigenvalues so semantics are
    # preserved for well-conditioned inputs.
    S, U = jnp.linalg.eigh(covs)
    S = jnp.maximum(S, eps)
    return jnp.einsum('kij,kj,klj->kil', U, lax.rsqrt(S), U)


# ----------------------------------------------------------------------------
# Full forward pass (training branch of ShuffledGroupWhitening.forward)
# ----------------------------------------------------------------------------
@functools.partial(jax.jit,
                   static_argnames=("num_groups", "shuffle", "matmul_dtype"))
def shuffled_group_whitening_forward(x, *, num_groups, shuffle=True, key=None,
                                     matmul_dtype=jnp.float32):
    """matmul_dtype=jnp.bfloat16 enables the bf16-input / fp32-accumulate MXU
    path for the apply matmul (v5e/v6e/v7x throughput); fp32 is the default to
    match the reference numerics.  Covariance accumulation is always fp32."""
    N, D = x.shape
    G = num_groups
    assert D % G == 0
    d = D // G
    assert N % 3 == 0, "N must be divisible by 3 (num_pos=3)"
    B = N // 3
    shuffle = bool(shuffle) and (G != 1)       # module disables shuffle if G==1

    # running_mean / running_covariance buffers: kept for parity with the
    # module's __init__; the training-mode forward never reads / updates them.
    _running_mean = jnp.zeros((D,), jnp.float32)
    _running_covariance = jnp.eye(D, dtype=jnp.float32)

    x_sh = x.astype(jnp.float32).reshape(3, B, D)          # free (no transpose)
    if shuffle:
        if key is None:
            key = jax.random.PRNGKey(0)
        keys = jax.random.split(key, 3)
        perms = jnp.stack(
            [jax.random.permutation(keys[i], D) for i in range(3)])
        # TODO(synk): per-column shuffle stays a plain-JAX lane gather.
        x_sh = jnp.take_along_axis(x_sh, perms[:, None, :], axis=2)

    P = _choose_groups_per_pack(G, d)          # groups per lane-dense pack
    Pd = P * d
    n_packs = D // Pd
    TB = _choose_batch_tile(B, Pd)

    # Kernel 1: per-(sub-batch, pack) column sums and raw second moment.
    sum_x, sum_xxT = group_moments(x_sh, Pd, TB)

    # Tiny glue math (arrays are ~KB): mean/covariance, per-group eigh,
    # block-diagonal whitening matrix, fused-centering bias.
    inv_b = jnp.float32(1.0 / B)
    mean = sum_x * inv_b                                   # (3, n_packs, 1, Pd)
    cov_full = sum_xxT * inv_b - jnp.einsum('snia,snib->snab', mean, mean)
    eyeP = jnp.eye(P, dtype=cov_full.dtype)
    covs6 = cov_full.reshape(3, n_packs, P, d, P, d)
    covs = jnp.einsum('snpaqb,pq->snpab', covs6, eyeP)     # diagonal d x d blocks
    W = _whitening_matrices(covs.reshape(3 * n_packs * P, d, d))
    W = W.reshape(3, n_packs, P, d, d)
    w_blk = jnp.einsum('pq,snpab->snpaqb', eyeP, W).reshape(3, n_packs, Pd, Pd)
    bias = jnp.matmul(mean, w_blk)                         # mean @ W_blk

    # Kernel 2: y = x @ W_blk - bias  (centering fused; xc never hits HBM).
    y_sh = whiten_apply(x_sh, w_blk, bias, TB, matmul_dtype=matmul_dtype)

    if shuffle:
        inv = jnp.argsort(perms, axis=1)
        y_sh = jnp.take_along_axis(y_sh, inv[:, None, :], axis=2)
    return y_sh.reshape(N, D)


# ----------------------------------------------------------------------------
# Pure-JAX reference (mirrors the PyTorch module op-for-op) for validation.
# ----------------------------------------------------------------------------
def _reference_forward(x, *, num_groups, shuffle, key):
    N, D = x.shape
    G = num_groups
    d = D // G
    batch = N // 3
    shuffle = bool(shuffle) and (G != 1)
    keys = jax.random.split(key, 3) if shuffle else None
    outs = []
    for i in range(3):
        xi = x[i * batch:(i + 1) * batch].astype(jnp.float32)
        if shuffle:
            perm = jax.random.permutation(keys[i], D)
            xi = xi[:, perm]
        xg = xi.reshape(batch, G, d)
        xg = xg - xg.mean(axis=0, keepdims=True)
        xg = xg.transpose(1, 0, 2)                          # (G, batch, d)
        covs = jnp.einsum('gbi,gbj->gij', xg, xg) / batch
        S, U = jnp.linalg.eigh(covs)
        W = jnp.einsum('gij,gj,gkj->gik', U, 1.0 / jnp.sqrt(S), U)
        y = jnp.einsum('gbi,gij->gbj', xg, W)
        if shuffle:
            inv = jnp.argsort(perm)
            yi = y.transpose(0, 2, 1).reshape(D, batch)[inv].T
        else:
            yi = y.transpose(1, 0, 2).reshape(batch, D)
        outs.append(yi)
    return jnp.concatenate(outs, axis=0)


# ----------------------------------------------------------------------------
if __name__ == "__main__":
    root = jax.random.PRNGKey(0)
    k_x1, k_p1, k_x2, k_p2 = jax.random.split(root, 4)

    # Config 1: N=96 (batch 32), D=512, 64 groups of d=8 -> two lane-dense
    # packs of 32 groups (Pd = 256), shuffle on.
    N1, D1, G1 = 96, 512, 64
    x1 = jax.random.normal(k_x1, (N1, D1), dtype=jnp.float32)
    out1 = shuffled_group_whitening_forward(
        x1, num_groups=G1, shuffle=True, key=k_p1)
    out1 = jax.block_until_ready(out1)
    ref1 = _reference_forward(x1, num_groups=G1, shuffle=True, key=k_p1)
    assert out1.shape == (N1, D1)
    assert bool(jnp.all(jnp.isfinite(out1)))
    assert bool(jnp.allclose(out1, ref1, atol=1e-2, rtol=1e-2)), \
        float(jnp.max(jnp.abs(out1 - ref1)))

    # Config 1b: same problem on the bf16-input / fp32-accumulate MXU path.
    out1_bf16 = shuffled_group_whitening_forward(
        x1, num_groups=G1, shuffle=True, key=k_p1, matmul_dtype=jnp.bfloat16)
    out1_bf16 = jax.block_until_ready(out1_bf16)
    assert bool(jnp.all(jnp.isfinite(out1_bf16)))
    assert float(jnp.max(jnp.abs(out1_bf16 - out1))) < 0.5

    # Config 2: small D (< 128) single pack (D=32, 4 groups of 8), shuffle on,
    # plus the shuffle=False branch.
    N2, D2, G2 = 96, 32, 4
    x2 = jax.random.normal(k_x2, (N2, D2), dtype=jnp.float32)
    out2 = shuffled_group_whitening_forward(
        x2, num_groups=G2, shuffle=True, key=k_p2)
    out2 = jax.block_until_ready(out2)
    ref2 = _reference_forward(x2, num_groups=G2, shuffle=True, key=k_p2)
    assert out2.shape == (N2, D2)
    assert bool(jnp.allclose(out2, ref2, atol=1e-2, rtol=1e-2)), \
        float(jnp.max(jnp.abs(out2 - ref2)))

    out3 = shuffled_group_whitening_forward(
        x2, num_groups=G2, shuffle=False, key=k_p2)
    out3 = jax.block_until_ready(out3)
    ref3 = _reference_forward(x2, num_groups=G2, shuffle=False, key=k_p2)
    assert bool(jnp.allclose(out3, ref3, atol=1e-2, rtol=1e-2)), \
        float(jnp.max(jnp.abs(out3 - ref3)))

    print("KERNEL_OK")
</pallas_src>

<mosaic_0001>
module attributes {stable_mosaic.version = 11 : i64} {
  func.func @_moments_kernel(%arg0: i32, %arg1: i32, %arg2: i32, %arg3: memref<1x32x256xf32, #tpu.memory_space<vmem>>, %arg4: memref<1x1x1x256xf32, #tpu.memory_space<vmem>>, %arg5: memref<1x1x256x256xf32, #tpu.memory_space<vmem>>) attributes {dimension_semantics = [#tpu.dimension_semantics<parallel>, #tpu.dimension_semantics<parallel>, #tpu.dimension_semantics<arbitrary>], iteration_bounds = array<i64: 3, 2, 1>, scalar_prefetch = 0 : i64, scratch_operands = 0 : i64, tpu.core_type = #tpu.core_type<tc>, window_params = [{transform_indices = @transform_0, window_bounds = array<i64: 1, 32, 256>}, {transform_indices = @transform_1, window_bounds = array<i64: 1, 1, 1, 256>}, {transform_indices = @transform_2, window_bounds = array<i64: 1, 1, 256, 256>}]} {
    %c0_i32 = arith.constant 0 : i32
    %0 = arith.cmpi eq, %arg2, %c0_i32 : i32
    %1 = arith.extui %0 : i1 to i32
    %c0_i32_0 = arith.constant 0 : i32
    %2 = arith.cmpi ne, %1, %c0_i32_0 : i32
    scf.if %2 {
      %cst_20 = arith.constant 0.000000e+00 : f32
      %20 = vector.broadcast %cst_20 : f32 to vector<1x1x1x256xf32>
      %c0_21 = arith.constant 0 : index
      %c0_22 = arith.constant 0 : index
      %c0_23 = arith.constant 0 : index
      %c0_24 = arith.constant 0 : index
      %21 = vector.load %arg4[%c0_21, %c0_22, %c0_23, %c0_24] : memref<1x1x1x256xf32, #tpu.memory_space<vmem>>, vector<1x1x1x256xf32>
      tpu.vector_store %arg4[%c0_21, %c0_22, %c0_23, %c0_24], %20 {strides = array<i32>} : memref<1x1x1x256xf32, #tpu.memory_space<vmem>>, vector<1x1x1x256xf32>,
      %cst_25 = arith.constant 0.000000e+00 : f32
      %22 = vector.broadcast %cst_25 : f32 to vector<1x1x256x256xf32>
      %c0_26 = arith.constant 0 : index
      %c0_27 = arith.constant 0 : index
      %c0_28 = arith.constant 0 : index
      %c0_29 = arith.constant 0 : index
      %23 = vector.load %arg5[%c0_26, %c0_27, %c0_28, %c0_29] : memref<1x1x256x256xf32, #tpu.memory_space<vmem>>, vector<1x1x256x256xf32>
      tpu.vector_store %arg5[%c0_26, %c0_27, %c0_28, %c0_29], %22 {strides = array<i32>} : memref<1x1x256x256xf32, #tpu.memory_space<vmem>>, vector<1x1x256x256xf32>,
    } else {
    }
    %c0 = arith.constant 0 : index
    %c0_1 = arith.constant 0 : index
    %c0_2 = arith.constant 0 : index
    %3 = vector.load %arg3[%c0, %c0_1, %c0_2] : memref<1x32x256xf32, #tpu.memory_space<vmem>>, vector<1x32x256xf32>
    %4 = vector.shape_cast %3 : vector<1x32x256xf32> to vector<32x256xf32>
    %c0_3 = arith.constant 0 : index
    %c0_4 = arith.constant 0 : index
    %c0_5 = arith.constant 0 : index
    %c0_6 = arith.constant 0 : index
    %5 = vector.load %arg4[%c0_3, %c0_4, %c0_5, %c0_6] : memref<1x1x1x256xf32, #tpu.memory_space<vmem>>, vector<1x1x1x256xf32>
    %6 = vector.shape_cast %5 : vector<1x1x1x256xf32> to vector<1x256xf32>
    %cst = arith.constant dense<0.000000e+00> : vector<256xf32>
    %7 = vector.multi_reduction <add>, %4, %cst [0] : vector<32x256xf32> to vector<256xf32>
    %8 = vector.shape_cast %7 : vector<256xf32> to vector<1x256xf32>
    %9 = arith.addf %6, %8 : vector<1x256xf32>
    %c0_7 = arith.constant 0 : index
    %c0_8 = arith.constant 0 : index
    %c0_9 = arith.constant 0 : index
    %c0_10 = arith.constant 0 : index
    %10 = vector.load %arg4[%c0_7, %c0_8, %c0_9, %c0_10] : memref<1x1x1x256xf32, #tpu.memory_space<vmem>>, vector<1x1x1x256xf32>
    %11 = vector.shape_cast %10 : vector<1x1x1x256xf32> to vector<1x256xf32>
    %12 = vector.shape_cast %9 : vector<1x256xf32> to vector<1x1x1x256xf32>
    tpu.vector_store %arg4[%c0_7, %c0_8, %c0_9, %c0_10], %12 {strides = array<i32>} : memref<1x1x1x256xf32, #tpu.memory_space<vmem>>, vector<1x1x1x256xf32>,
    %c0_11 = arith.constant 0 : index
    %c0_12 = arith.constant 0 : index
    %c0_13 = arith.constant 0 : index
    %c0_14 = arith.constant 0 : index
    %13 = vector.load %arg5[%c0_11, %c0_12, %c0_13, %c0_14] : memref<1x1x256x256xf32, #tpu.memory_space<vmem>>, vector<1x1x256x256xf32>
    %14 = vector.shape_cast %13 : vector<1x1x256x256xf32> to vector<256x256xf32>
    %cst_15 = arith.constant dense<0.000000e+00> : vector<256x256xf32>
    %15 = tpu.matmul %4, %4, %cst_15 {dimension_numbers = #tpu.dot_dimension_numbers<[0], [0], [1], [1], [0, 1, 1, 1], [], []>} : vector<32x256xf32>, vector<32x256xf32>, vector<256x256xf32> -> vector<256x256xf32>
    %16 = arith.addf %14, %15 : vector<256x256xf32>
    %c0_16 = arith.constant 0 : index
    %c0_17 = arith.constant 0 : index
    %c0_18 = arith.constant 0 : index
    %c0_19 = arith.constant 0 : index
    %17 = vector.load %arg5[%c0_16, %c0_17, %c0_18, %c0_19] : memref<1x1x256x256xf32, #tpu.memory_space<vmem>>, vector<1x1x256x256xf32>
    %18 = vector.shape_cast %17 : vector<1x1x256x256xf32> to vector<256x256xf32>
    %19 = vector.shape_cast %16 : vector<256x256xf32> to vector<1x1x256x256xf32>
    tpu.vector_store %arg5[%c0_16, %c0_17, %c0_18, %c0_19], %19 {strides = array<i32>} : memref<1x1x256x256xf32, #tpu.memory_space<vmem>>, vector<1x1x256x256xf32>,
    return
  }
  func.func @transform_0(%arg0: i32, %arg1: i32, %arg2: i32) -> (i32, i32, i32) {
    %c0_i32 = arith.constant 0 : i32
    return %arg0, %arg2, %arg1 : i32, i32, i32
  }
  func.func @transform_1(%arg0: i32, %arg1: i32, %arg2: i32) -> (i32, i32, i32, i32) {
    %c0_i32 = arith.constant 0 : i32
    %c0_i32_0 = arith.constant 0 : i32
    %c0_i32_1 = arith.constant 0 : i32
    return %arg0, %arg1, %c0_i32, %c0_i32_0 : i32, i32, i32, i32
  }
  func.func @transform_2(%arg0: i32, %arg1: i32, %arg2: i32) -> (i32, i32, i32, i32) {
    %c0_i32 = arith.constant 0 : i32
    %c0_i32_0 = arith.constant 0 : i32
    %c0_i32_1 = arith.constant 0 : i32
    return %arg0, %arg1, %c0_i32, %c0_i32_0 : i32, i32, i32, i32
  }
}

module attributes {stable_mosaic.version = 11 : i64} {
  func.func @_apply_kernel(%arg0: i32, %arg1: i32, %arg2: i32, %arg3: memref<1x32x256xf32, #tpu.memory_space<vmem>>, %arg4: memref<1x1x256x256xf32, #tpu.memory_space<vmem>>, %arg5: memref<1x1x1x256xf32, #tpu.memory_space<vmem>>, %arg6: memref<1x32x256xf32, #tpu.memory_space<vmem>>) attributes {dimension_semantics = [#tpu.dimension_semantics<parallel>, #tpu.dimension_semantics<parallel>, #tpu.dimension_semantics<parallel>], iteration_bounds = array<i64: 3, 2, 1>, scalar_prefetch = 0 : i64, scratch_operands = 0 : i64, tpu.core_type = #tpu.core_type<tc>, window_params = [{transform_indices = @transform_0, window_bounds = array<i64: 1, 32, 256>}, {transform_indices = @transform_1, window_bounds = array<i64: 1, 1, 256, 256>}, {transform_indices = @transform_2, window_bounds = array<i64: 1, 1, 1, 256>}, {transform_indices = @transform_3, window_bounds = array<i64: 1, 32, 256>}]} {
    %c0 = arith.constant 0 : index
    %c0_0 = arith.constant 0 : index
    %c0_1 = arith.constant 0 : index
    %0 = vector.load %arg3[%c0, %c0_0, %c0_1] : memref<1x32x256xf32, #tpu.memory_space<vmem>>, vector<1x32x256xf32>
    %1 = vector.shape_cast %0 : vector<1x32x256xf32> to vector<32x256xf32>
    %c0_2 = arith.constant 0 : index
    %c0_3 = arith.constant 0 : index
    %c0_4 = arith.constant 0 : index
    %c0_5 = arith.constant 0 : index
    %2 = vector.load %arg4[%c0_2, %c0_3, %c0_4, %c0_5] : memref<1x1x256x256xf32, #tpu.memory_space<vmem>>, vector<1x1x256x256xf32>
    %3 = vector.shape_cast %2 : vector<1x1x256x256xf32> to vector<256x256xf32>
    %cst = arith.constant dense<0.000000e+00> : vector<32x256xf32>
    %4 = tpu.matmul %1, %3, %cst {dimension_numbers = #tpu.dot_dimension_numbers<[1], [0], [0], [1], [0, 0, 1, 1], [], []>} : vector<32x256xf32>, vector<256x256xf32>, vector<32x256xf32> -> vector<32x256xf32>
    %c0_6 = arith.constant 0 : index
    %c0_7 = arith.constant 0 : index
    %c0_8 = arith.constant 0 : index
    %c0_9 = arith.constant 0 : index
    %5 = vector.load %arg5[%c0_6, %c0_7, %c0_8, %c0_9] : memref<1x1x1x256xf32, #tpu.memory_space<vmem>>, vector<1x1x1x256xf32>
    %6 = vector.shape_cast %5 : vector<1x1x1x256xf32> to vector<1x256xf32>
    %7 = vector.broadcast %6 : vector<1x256xf32> to vector<32x256xf32>
    %8 = arith.subf %4, %7 : vector<32x256xf32>
    %c0_10 = arith.constant 0 : index
    %c0_11 = arith.constant 0 : index
    %c0_12 = arith.constant 0 : index
    %9 = vector.load %arg6[%c0_10, %c0_11, %c0_12] : memref<1x32x256xf32, #tpu.memory_space<vmem>>, vector<1x32x256xf32>
    %10 = vector.shape_cast %9 : vector<1x32x256xf32> to vector<32x256xf32>
    %11 = vector.shape_cast %8 : vector<32x256xf32> to vector<1x32x256xf32>
    tpu.vector_store %arg6[%c0_10, %c0_11, %c0_12], %11 {strides = array<i32>} : memref<1x32x256xf32, #tpu.memory_space<vmem>>, vector<1x32x256xf32>,
    return
  }
  func.func @transform_0(%arg0: i32, %arg1: i32, %arg2: i32) -> (i32, i32, i32) {
    %c0_i32 = arith.constant 0 : i32
    return %arg0, %arg2, %arg1 : i32, i32, i32
  }
  func.func @transform_1(%arg0: i32, %arg1: i32, %arg2: i32) -> (i32, i32, i32, i32) {
    %c0_i32 = arith.constant 0 : i32
    %c0_i32_0 = arith.constant 0 : i32
    %c0_i32_1 = arith.constant 0 : i32
    return %arg0, %arg1, %c0_i32, %c0_i32_0 : i32, i32, i32, i32
  }
  func.func @transform_2(%arg0: i32, %arg1: i32, %arg2: i32) -> (i32, i32, i32, i32) {
    %c0_i32 = arith.constant 0 : i32
    %c0_i32_0 = arith.constant 0 : i32
    %c0_i32_1 = arith.constant 0 : i32
    return %arg0, %arg1, %c0_i32, %c0_i32_0 : i32, i32, i32, i32
  }
  func.func @transform_3(%arg0: i32, %arg1: i32, %arg2: i32) -> (i32, i32, i32) {
    %c0_i32 = arith.constant 0 : i32
    return %arg0, %arg2, %arg1 : i32, i32, i32
  }
}

</mosaic_0001>

<bundles_post_ra>
// kernel: shuffled_group_whitening_forward.4
= control target key start
LH: loop header
LB: loop body
LE: loop exit
PB: predicated region body
PF: predicated region fallthrough
CT: control target
= control target key end

     0   :  { %s1308_s9 = smov 0   ;;  %s1310_s10 = smov 0   ;;  %s1551_s0 = inlined_call_operand.vmem [shape: f32[3,32,512], index: 0, kind: input, shape index: {}]   ;;  %s1552_s1 = inlined_call_operand.vmem [shape: f32[3,2,1,256], index: 1, kind: output, shape index: {0}]   ;;  %s1553_s2 = inlined_call_operand.vmem [shape: f32[3,2,256,256], index: 2, kind: output, shape index: {1}]  }
   0x1   :  { %s1312_s11 = smov 0   ;;  %s1314_s12 = smov 0  }
   0x2   :  { %s1316_s13 = smov 0   ;;  %s1318_s14 = smov 0  }
   0x3   :  { %s1320_s15 = smov 0  }
   0x4 LB: > { %s28_s16 = sadd.s32 1, %s1281_s13  ;;  %s32_s17 = sadd.s32 1, %s1285_s14  ;;  %s1289_s15 = sphi %s1320_s15, %s13_s15   ;;  %s1285_s14 = sphi %s1318_s14, %s1561_s14   ;;  %s1281_s13 = sphi %s1316_s13, %s1560_s13   ;;  %s1277_s12 = sphi %s1314_s12, %s1559_s12   ;;  %s1273_s11 = sphi %s1312_s11, %s1558_s11   ;;  %s1269_s10 = sphi %s1310_s10, %s1557_s10   ;;  %s1265_s9 = sphi %s1308_s9, %s1556_s9  }
   0x5   : > { %p30_p0 = scmp.ge.s32.totalorder %s28_s16, 2  ;;  %p50_p1 = scmp.ne.s32.totalorder %s1269_s10, %s1265_s9 }
   0x6   : > { %p51_p2 = scmp.eq.s32.totalorder %s1289_s15, 0  ;;  %s43_s21 = sadd.s32 1, %s1269_s10 }
   0x7   : > { %s1563_s16 = smov (%p30_p0, %s28_s16), 0  ;;  %s1565_s17 = smov (!%p30_p0, %s32_s17), %s1285_s14 }
   0x8   : > { %p52_p3 = por %p51_p2, %p50_p1  ;;  %p34_p4 = scmp.ge.s32.totalorder %s1565_s17, 3 }
   0x9   : > { %s39_s18 = ssub.s32 %s1281_s13, %s1563_s16  ;;  %p1123_p6 = scmp.ge.s32.totalorder %s1289_s15, 6 }
   0xa   : > { %s1567_s17 = smov (%p34_p4, %s1565_s17), 0 }
   0xb   : > { %s36_s19 = ssub.s32 %s1285_s14, %s1567_s17  ;;  %132 = sbr.rel (%p1123_p6) target bundleno = 27 (0x1b), region = 16 }
   0xc   : > { %s40_s20 = sor.u32 %s39_s18, %s36_s19 }
   0xd   : > { %p41_p5 = scmp.eq.s32.totalorder %s40_s20, 0 }
   0xf   : > { %s1359_s22 = scalar_select %p41_p5, %s1269_s10, %s43_s21  }
  0x10   : > { %135 = sbr.rel (!%p52_p3) target bundleno = 27 (0x1b), region = 20  ;;  %s137_s23 = sand.u32 (%p52_p3), 1, %s1269_s10  }
  0x11   : > { %s1125_s24 = sshll.u32 (%p52_p3), %s1281_s13, 1  ;;  %s1124_s25 = sshll.u32 (%p52_p3), %s137_s23, 6 }
  0x12   : > { %s1126_s26 = sshll.u32 (%p52_p3), %s1285_s14, 4  ;;  %s139_s4 = scalar_lea.vmem (%p52_p3), [#allocation2], %s1124_s25 }
  0x13   : > { %s145_s27 = sadd.s32 (%p52_p3), %s1126_s26, %s1125_s24 }
  0x14   : > { %s1127_s28 = sshll.u32 (%p52_p3), %s145_s27, 3 }
  0x15   : > { %s147_s3 = scalar_lea.vmem %s1551_s0, %s1127_s28 }
  0x16   : > { %v160_v0 = vld [vmem:[%s147_s3] sm:$0xff]  ;;  %v162_v1 = vld [vmem:[%s147_s3 + $0x8] sm:$0xff] }
  0x17   : > { %v164_v2 = vld [vmem:[%s147_s3 + $0x20] sm:$0xff]  ;;  %161 = vst [vmem:[%s139_s4] sm:$0xff] %v160_v0  ;;  %163 = vst [vmem:[%s139_s4 + $0x8] sm:$0xff] %v162_v1  ;;  %v166_v3 = vld [vmem:[%s147_s3 + $0x28] sm:$0xff] }
  0x18   : > { %165 = vst [vmem:[%s139_s4 + $0x10] sm:$0xff] %v164_v2  ;;  %v168_v4 = vld [vmem:[%s147_s3 + $0x40] sm:$0xff]  ;;  %v170_v5 = vld [vmem:[%s147_s3 + $0x48] sm:$0xff]  ;;  %167 = vst [vmem:[%s139_s4 + $0x18] sm:$0xff] %v166_v3 }
  0x19   : > { %169 = vst [vmem:[%s139_s4 + $0x20] sm:$0xff] %v168_v4  ;;  %171 = vst [vmem:[%s139_s4 + $0x28] sm:$0xff] %v170_v5  ;;  %v172_v6 = vld [vmem:[%s147_s3 + $0x60] sm:$0xff]  ;;  %v174_v7 = vld [vmem:[%s147_s3 + $0x68] sm:$0xff] }
  0x1a   : > { %173 = vst [vmem:[%s139_s4 + $0x30] sm:$0xff] %v172_v6  ;;  %175 = vst [vmem:[%s139_s4 + $0x38] sm:$0xff] %v174_v7 }
  0x1b PF: > { %p1128_p7 = scmp.ge.s32.totalorder %s1289_s15, 1  ;;  %p180_p8 = scmp.lt.s32.totalorder %s1289_s15, 7 }
  0x1d   : > { %p181_p9 = pnand %p1128_p7, %p180_p8 }
  0x1e   : > { %s187_s5 = sand.u32 (!%p181_p9), 1, %s1265_s9   ;;  %p222_p10 = scmp.lt.s32.totalorder (!%p181_p9), %s1277_s12, 2 }
  0x1f   : > { %184 = sbr.rel (%p181_p9) target bundleno = 419 (0x1a3), region = 43  ;;  %s1129_s6 = sshll.u32 (!%p181_p9), %s187_s5, 6 }
  0x20   : > { %p224_p11 = scmp.lt.s32.totalorder (!%p181_p9), %s1273_s11, 1  ;;  %s189_s7 = scalar_lea.vmem (!%p181_p9), [#allocation2], %s1129_s6 }
  0x24   : > { %v1291_v8 = vmov 0.0   ;;  %v243_v9 = vlaneseq  ;;  %v313_v10 = vld [vmem:[%s189_s7 + $0x8] sm:$0xff]  ;;  %v312_v11 = vld [vmem:[%s189_s7] sm:$0xff]  ;;  %v315_v12 = vld [vmem:[%s189_s7 + $0x18] sm:$0xff]  ;;  %s1569_s12 = smov (!%p222_p10, %s1277_s12), 2  ;;  %s1571_s11 = smov (!%p224_p11, %s1273_s11), 1 }
  0x25   : > { %652 = vmatprep.mubr.f32.mxu0 %v1291_v8  ;;  %748 = vmatprep.mubr.f32.mxu1 %v1291_v8  ;;  %v330_v13 = vadd.f32 %v315_v12, %v313_v10  ;;  %v314_v14 = vld [vmem:[%s189_s7 + $0x10] sm:$0xff]  ;;  %v317_v16 = vld [vmem:[%s189_s7 + $0x28] sm:$0xff]  ;;  %v319_v17 = vld [vmem:[%s189_s7 + $0x38] sm:$0xff]  ;;  %s1131_s8 = sshll.u32 %s1569_s12, 2  ;;  %s1133_s9 = sshll.u32 %s1569_s12, 7  ;;  %vm491_vm1 = vcmask 261120  }
  0x26   : > { %459 = vxpose.xlu1.b32.start [1/4] (short) %v313_v10, 128  ;;  %427 = vxpose.xlu0.b32.start [1/4] (short) %v312_v11, 128  ;;  %v321_v15 = vadd.f32 %v314_v14, %v312_v11  ;;  %v316_v19 = vld [vmem:[%s189_s7 + $0x20] sm:$0xff]  ;;  %s1130_s18 = sshll.u32 %s1571_s11, 1  ;;  %s1132_s19 = sshll.u32 %s1571_s11, 6  ;;  %vm1379_vm0 = vcmp.lt.s32.totalorder %v243_v9, 256  ;;  %v318_v21 = vld [vmem:[%s189_s7 + $0x30] sm:$0xff]  ;;  %v346_v35 = vshrl.u32 %v243_v9, 7 }
  0x27   : > { %v331_v18 = vadd.f32 %v330_v13, %v317_v16  ;;  %612 = vmatprep.subr.mxu0 %v319_v17  ;;  %1169 = vmatprep.subr.mxu1 %v319_v17  ;;  %s228_s20 = sadd.s32 %s1131_s8, %s1130_s18  ;;  %s1383_s21 = sadd.s32 %s1133_s9, %s1132_s19  ;;  %v1292_v28 = vmov 1966171168  }
  0x28   : > { %v322_v22 = vadd.f32 %v321_v15, %v316_v19  ;;  %613 = vmatpush1.msra.mxu0 %v318_v21  ;;  %1173 = vmatpush1.msra.mxu1 %v318_v21  ;;  %s1388_s11 = scalar_lea.vmem %s1552_s1, %s228_s20  ;;  %v343_v29 = vunpack.c.l.s4 %v1292_v28  ;;  %s1134_s24 = sshll.u32 %s1383_s21, 3 }
  0x29   : > { %v332_v23 = vadd.f32 %v331_v18, %v319_v17  ;;  %247 = vst.msk [vmem:[%s1388_s11] sm:$0x3] %vm1379_vm0, %v1291_v8  ;;  %614 = vmatprep.subr.mxu0 %v317_v16  ;;  %1170 = vmatprep.subr.mxu1 %v317_v16  ;;  %s1464_s27 = scalar_lea.vmem %s1553_s2, %s1134_s24 }
  0x2a   : > { %460 = vxpose.xlu1.b32.cont [2/4] (short) %v315_v12, 128  ;;  %428 = vxpose.xlu0.b32.cont [2/4] (short) %v314_v14, 128  ;;  %v323_v24 = vadd.f32 %v322_v22, %v318_v21  ;;  %v344_v34 = vunpack.c.0.s8 %v343_v29 }
  0x2b   : > { %v333_v25 = vrot.slane %v332_v23, 4  ;;  %615 = vmatpush1.msra.mxu0 %v316_v19  ;;  %1174 = vmatpush1.msra.mxu1 %v316_v19 }
  0x2c   : > { %v324_v26 = vrot.slane %v323_v24, 4  ;;  %616 = vmatprep.subr.mxu0 %v315_v12  ;;  %1171 = vmatprep.subr.mxu1 %v315_v12  ;;  %v347_v40 = vsub.s32 %v344_v34, %v346_v35 }
  0x2d   : > { %v334_v27 = vadd.f32 %v333_v25, %v332_v23  ;;  %617 = vmatpush1.msra.mxu0 %v314_v14  ;;  %1175 = vmatpush1.msra.mxu1 %v314_v14 }
  0x2e   : > { %461 = vxpose.xlu1.b32.cont [3/4] (short) %v317_v16, 128  ;;  %429 = vxpose.xlu0.b32.cont [3/4] (short) %v316_v19, 128  ;;  %v325_v30 = vadd.f32 %v324_v26, %v323_v24 }
  0x2f   : > { %v335_v31 = vrot.slane %v334_v27, 2  ;;  %618 = vmatprep.subr.mxu0 %v313_v10  ;;  %1172 = vmatprep.subr.mxu1 %v313_v10 }
  0x30   : > { %v326_v32 = vrot.slane %v325_v30, 2  ;;  %619 = vmatpush1.msra.mxu0 %v312_v11  ;;  %1176 = vmatpush1.msra.mxu1 %v312_v11  ;;  %v320_v44 = vld [vmem:[%s1388_s11] sm:$0x3] }
  0x31   : > { %v336_v33 = vadd.f32 %v335_v31, %v334_v27 }
  0x32   : > { %462 = vxpose.xlu1.b32.end [4/4] (short) %v319_v17, 128  ;;  %430 = vxpose.xlu0.b32.end [4/4] (short) %v318_v21, 128  ;;  %v327_v36 = vadd.f32 %v326_v32, %v325_v30 }
  0x33   : > { %v337_v37 = vrot.slane %v336_v33, 1 }
  0x34   : > { %v328_v38 = vrot.slane %v327_v36, 1 }
  0x35   : > { %v338_v39 = vadd.f32 %v337_v37, %v336_v33 }
  0x36   : > { %v329_v41 = vadd.f32 %v328_v38, %v327_v36 }
  0x38   : > { %v341_v42 = vcombine.low %v329_v41, %v338_v39 }
  0x3a   : > { %v348_v43 = vrot.slane %v341_v42, %v347_v40 }
  0x3c   : > { %v355_v45 = vrot.slane %v348_v43, %v347_v40 }
  0x3e   : > { %v357_v46 = vadd.f32 %v355_v45, %v320_v44 }
  0x40   : > { %362 = vst.msk [vmem:[%s1388_s11] sm:$0x3] %vm1379_vm0, %v357_v46 }
  0xa2   : > { %v475_v47 = vpop.trf.xlu1  ;;  %v443_v48 = vpop.trf.xlu0 }
  0xa3   : > { %1135 = vmatmul.mubr.msk.f32.vlgmr.msra.gmra.mxu0 %vm491_vm1, %v443_v48  ;;  %1151 = vmatmul.mubr.msk.f32.vlgmr.msra.gmra.mxu1 %vm491_vm1, %v475_v47 }
  0xa4   : > { %658 = vmatprep.mubr.f32.mxu0 %v1291_v8  ;;  %754 = vmatprep.mubr.f32.mxu1 %v1291_v8 }
  0xa6   : > { %v476_v49 = vpop.trf.xlu1  ;;  %v444_v50 = vpop.trf.xlu0 }
  0xa7   : > { %1136 = vmatmul.mubr.msk.f32.gmra.mxu0 %vm491_vm1, %v444_v50  ;;  %1152 = vmatmul.mubr.msk.f32.gmra.mxu1 %vm491_vm1, %v476_v49 }
  0xa8   : > { %664 = vmatprep.mubr.f32.mxu0 %v1291_v8  ;;  %760 = vmatprep.mubr.f32.mxu1 %v1291_v8 }
  0xaa   : > { %v477_v51 = vpop.trf.xlu1  ;;  %v445_v52 = vpop.trf.xlu0 }
  0xab   : > { %1137 = vmatmul.mubr.msk.f32.gmra.mxu0 %vm491_vm1, %v445_v52  ;;  %1153 = vmatmul.mubr.msk.f32.gmra.mxu1 %vm491_vm1, %v477_v51 }
  0xac   : > { %670 = vmatprep.mubr.f32.mxu0 %v1291_v8  ;;  %766 = vmatprep.mubr.f32.mxu1 %v1291_v8 }
  0xae   : > { %v478_v53 = vpop.trf.xlu1  ;;  %v446_v54 = vpop.trf.xlu0 }
  0xaf   : > { %1138 = vmatmul.mubr.msk.f32.gmra.mxu0 %vm491_vm1, %v446_v54  ;;  %1154 = vmatmul.mubr.msk.f32.gmra.mxu1 %vm491_vm1, %v478_v53 }
  0xb0   : > { %676 = vmatprep.mubr.f32.mxu0 %v1291_v8  ;;  %772 = vmatprep.mubr.f32.mxu1 %v1291_v8 }
  0xb2   : > { %v479_v55 = vpop.trf.xlu1  ;;  %v447_v56 = vpop.trf.xlu0 }
  0xb3   : > { %1139 = vmatmul.mubr.msk.f32.gmra.mxu0 %vm491_vm1, %v447_v56  ;;  %1155 = vmatmul.mubr.msk.f32.gmra.mxu1 %vm491_vm1, %v479_v55 }
  0xb4   : > { %682 = vmatprep.mubr.f32.mxu0 %v1291_v8  ;;  %778 = vmatprep.mubr.f32.mxu1 %v1291_v8 }
  0xb6   : > { %v480_v57 = vpop.trf.xlu1  ;;  %v448_v58 = vpop.trf.xlu0 }
  0xb7   : > { %1140 = vmatmul.mubr.msk.f32.gmra.mxu0 %vm491_vm1, %v448_v58  ;;  %1156 = vmatmul.mubr.msk.f32.gmra.mxu1 %vm491_vm1, %v480_v57 }
  0xb8   : > { %688 = vmatprep.mubr.f32.mxu0 %v1291_v8  ;;  %784 = vmatprep.mubr.f32.mxu1 %v1291_v8 }
  0xba   : > { %v481_v59 = vpop.trf.xlu1  ;;  %v449_v60 = vpop.trf.xlu0 }
  0xbb   : > { %1141 = vmatmul.mubr.msk.f32.gmra.mxu0 %vm491_vm1, %v449_v60  ;;  %1157 = vmatmul.mubr.msk.f32.gmra.mxu1 %vm491_vm1, %v481_v59 }
  0xbc   : > { %694 = vmatprep.mubr.f32.mxu0 %v1291_v8  ;;  %790 = vmatprep.mubr.f32.mxu1 %v1291_v8 }
  0xbe   : > { %v482_v61 = vpop.trf.xlu1  ;;  %v450_v62 = vpop.trf.xlu0 }
  0xbf   : > { %1142 = vmatmul.mubr.msk.f32.gmra.mxu0 %vm491_vm1, %v450_v62  ;;  %1158 = vmatmul.mubr.msk.f32.gmra.mxu1 %vm491_vm1, %v482_v61 }
  0xc0   : > { %700 = vmatprep.mubr.f32.mxu0 %v1291_v8  ;;  %796 = vmatprep.mubr.f32.mxu1 %v1291_v8 }
  0xc2   : > { %v483_v63 = vpop.trf.xlu1  ;;  %v451_v0 = vpop.trf.xlu0 }
  0xc3   : > { %1143 = vmatmul.mubr.msk.f32.gmra.mxu0 %vm491_vm1, %v451_v0  ;;  %1159 = vmatmul.mubr.msk.f32.gmra.mxu1 %vm491_vm1, %v483_v63 }
  0xc4   : > { %706 = vmatprep.mubr.f32.mxu0 %v1291_v8  ;;  %802 = vmatprep.mubr.f32.mxu1 %v1291_v8 }
  0xc6   : > { %v484_v1 = vpop.trf.xlu1  ;;  %v452_v2 = vpop.trf.xlu0 }
  0xc7   : > { %1144 = vmatmul.mubr.msk.f32.gmra.mxu0 %vm491_vm1, %v452_v2  ;;  %1160 = vmatmul.mubr.msk.f32.gmra.mxu1 %vm491_vm1, %v484_v1 }
  0xc8   : > { %712 = vmatprep.mubr.f32.mxu0 %v1291_v8  ;;  %808 = vmatprep.mubr.f32.mxu1 %v1291_v8 }
  0xca   : > { %v485_v3 = vpop.trf.xlu1  ;;  %v453_v4 = vpop.trf.xlu0 }
  0xcb   : > { %1145 = vmatmul.mubr.msk.f32.gmra.mxu0 %vm491_vm1, %v453_v4  ;;  %1161 = vmatmul.mubr.msk.f32.gmra.mxu1 %vm491_vm1, %v485_v3 }
  0xcc   : > { %718 = vmatprep.mubr.f32.mxu0 %v1291_v8  ;;  %814 = vmatprep.mubr.f32.mxu1 %v1291_v8 }
  0xce   : > { %v486_v5 = vpop.trf.xlu1  ;;  %v454_v6 = vpop.trf.xlu0 }
  0xcf   : > { %1146 = vmatmul.mubr.msk.f32.gmra.mxu0 %vm491_vm1, %v454_v6  ;;  %1162 = vmatmul.mubr.msk.f32.gmra.mxu1 %vm491_vm1, %v486_v5 }
  0xd0   : > { %724 = vmatprep.mubr.f32.mxu0 %v1291_v8  ;;  %820 = vmatprep.mubr.f32.mxu1 %v1291_v8 }
  0xd2   : > { %v487_v7 = vpop.trf.xlu1  ;;  %v455_v9 = vpop.trf.xlu0 }
  0xd3   : > { %1147 = vmatmul.mubr.msk.f32.gmra.mxu0 %vm491_vm1, %v455_v9  ;;  %1163 = vmatmul.mubr.msk.f32.gmra.mxu1 %vm491_vm1, %v487_v7 }
  0xd4   : > { %730 = vmatprep.mubr.f32.mxu0 %v1291_v8  ;;  %826 = vmatprep.mubr.f32.mxu1 %v1291_v8 }
  0xd6   : > { %v488_v10 = vpop.trf.xlu1  ;;  %v456_v11 = vpop.trf.xlu0 }
  0xd7   : > { %1148 = vmatmul.mubr.msk.f32.gmra.mxu0 %vm491_vm1, %v456_v11  ;;  %1164 = vmatmul.mubr.msk.f32.gmra.mxu1 %vm491_vm1, %v488_v10 }
  0xd8   : > { %736 = vmatprep.mubr.f32.mxu0 %v1291_v8  ;;  %832 = vmatprep.mubr.f32.mxu1 %v1291_v8 }
  0xda   : > { %v489_v12 = vpop.trf.xlu1  ;;  %v457_v13 = vpop.trf.xlu0 }
  0xdb   : > { %1149 = vmatmul.mubr.msk.f32.gmra.mxu0 %vm491_vm1, %v457_v13  ;;  %1165 = vmatmul.mubr.msk.f32.gmra.mxu1 %vm491_vm1, %v489_v12 }
  0xdc   : > { %742 = vmatprep.mubr.f32.mxu0 %v1291_v8  ;;  %838 = vmatprep.mubr.f32.mxu1 %v1291_v8 }
  0xde   : > { %v490_v14 = vpop.trf.xlu1  ;;  %v458_v15 = vpop.trf.xlu0 }
  0xdf   : > { %1150 = vmatmul.mubr.msk.f32.gmra.mxu0 %vm491_vm1, %v458_v15  ;;  %1166 = vmatmul.mubr.msk.f32.gmra.mxu1 %vm491_vm1, %v490_v14 }
 0x163   : > { %v654_v16 = vpop.f32.mrf.mxu0  ;;  %v750_v8 = vpop.f32.mrf.mxu1 }
 0x164   : > { %909 = vst [vmem:[%s1464_s27] sm:$0xff] %v654_v16  ;;  %941 = vst [vmem:[%s1464_s27 + $0x100] sm:$0xff] %v750_v8 }
 0x165   : > { %v656_v17 = vpop.f32.mrf.mxu0  ;;  %v752_v18 = vpop.f32.mrf.mxu1 }
 0x166   : > { %910 = vst [vmem:[%s1464_s27 + $0x8] sm:$0xff] %v656_v17  ;;  %942 = vst [vmem:[%s1464_s27 + $0x108] sm:$0xff] %v752_v18 }
 0x167   : > { %v660_v19 = vpop.f32.mrf.mxu0  ;;  %v756_v20 = vpop.f32.mrf.mxu1 }
 0x168   : > { %911 = vst [vmem:[%s1464_s27 + $0x10] sm:$0xff] %v660_v19  ;;  %943 = vst [vmem:[%s1464_s27 + $0x110] sm:$0xff] %v756_v20 }
 0x169   : > { %v662_v21 = vpop.f32.mrf.mxu0  ;;  %v758_v22 = vpop.f32.mrf.mxu1 }
 0x16a   : > { %912 = vst [vmem:[%s1464_s27 + $0x18] sm:$0xff] %v662_v21  ;;  %944 = vst [vmem:[%s1464_s27 + $0x118] sm:$0xff] %v758_v22 }
 0x16b   : > { %v666_v23 = vpop.f32.mrf.mxu0  ;;  %v762_v24 = vpop.f32.mrf.mxu1 }
 0x16c   : > { %913 = vst [vmem:[%s1464_s27 + $0x20] sm:$0xff] %v666_v23  ;;  %945 = vst [vmem:[%s1464_s27 + $0x120] sm:$0xff] %v762_v24 }
 0x16d   : > { %v668_v25 = vpop.f32.mrf.mxu0  ;;  %v764_v26 = vpop.f32.mrf.mxu1 }
 0x16e   : > { %914 = vst [vmem:[%s1464_s27 + $0x28] sm:$0xff] %v668_v25  ;;  %946 = vst [vmem:[%s1464_s27 + $0x128] sm:$0xff] %v764_v26 }
 0x16f   : > { %v672_v27 = vpop.f32.mrf.mxu0  ;;  %v768_v28 = vpop.f32.mrf.mxu1 }
 0x170   : > { %915 = vst [vmem:[%s1464_s27 + $0x30] sm:$0xff] %v672_v27  ;;  %947 = vst [vmem:[%s1464_s27 + $0x130] sm:$0xff] %v768_v28 }
 0x171   : > { %v674_v29 = vpop.f32.mrf.mxu0  ;;  %v770_v30 = vpop.f32.mrf.mxu1 }
 0x172   : > { %916 = vst [vmem:[%s1464_s27 + $0x38] sm:$0xff] %v674_v29  ;;  %948 = vst [vmem:[%s1464_s27 + $0x138] sm:$0xff] %v770_v30 }
 0x173   : > { %v678_v31 = vpop.f32.mrf.mxu0  ;;  %v774_v32 = vpop.f32.mrf.mxu1 }
 0x174   : > { %917 = vst [vmem:[%s1464_s27 + $0x40] sm:$0xff] %v678_v31  ;;  %949 = vst [vmem:[%s1464_s27 + $0x140] sm:$0xff] %v774_v32 }
 0x175   : > { %v680_v33 = vpop.f32.mrf.mxu0  ;;  %v776_v34 = vpop.f32.mrf.mxu1 }
 0x176   : > { %918 = vst [vmem:[%s1464_s27 + $0x48] sm:$0xff] %v680_v33  ;;  %950 = vst [vmem:[%s1464_s27 + $0x148] sm:$0xff] %v776_v34 }
 0x177   : > { %v684_v35 = vpop.f32.mrf.mxu0  ;;  %v780_v36 = vpop.f32.mrf.mxu1 }
 0x178   : > { %919 = vst [vmem:[%s1464_s27 + $0x50] sm:$0xff] %v684_v35  ;;  %951 = vst [vmem:[%s1464_s27 + $0x150] sm:$0xff] %v780_v36 }
 0x179   : > { %v686_v37 = vpop.f32.mrf.mxu0  ;;  %v782_v38 = vpop.f32.mrf.mxu1 }
 0x17a   : > { %920 = vst [vmem:[%s1464_s27 + $0x58] sm:$0xff] %v686_v37  ;;  %952 = vst [vmem:[%s1464_s27 + $0x158] sm:$0xff] %v782_v38 }
 0x17b   : > { %v690_v39 = vpop.f32.mrf.mxu0  ;;  %v786_v40 = vpop.f32.mrf.mxu1 }
 0x17c   : > { %921 = vst [vmem:[%s1464_s27 + $0x60] sm:$0xff] %v690_v39  ;;  %953 = vst [vmem:[%s1464_s27 + $0x160] sm:$0xff] %v786_v40 }
 0x17d   : > { %v692_v41 = vpop.f32.mrf.mxu0  ;;  %v788_v42 = vpop.f32.mrf.mxu1 }
 0x17e   : > { %922 = vst [vmem:[%s1464_s27 + $0x68] sm:$0xff] %v692_v41  ;;  %954 = vst [vmem:[%s1464_s27 + $0x168] sm:$0xff] %v788_v42 }
 0x17f   : > { %v696_v43 = vpop.f32.mrf.mxu0  ;;  %v792_v44 = vpop.f32.mrf.mxu1 }
 0x180   : > { %923 = vst [vmem:[%s1464_s27 + $0x70] sm:$0xff] %v696_v43  ;;  %955 = vst [vmem:[%s1464_s27 + $0x170] sm:$0xff] %v792_v44 }
 0x181   : > { %v698_v45 = vpop.f32.mrf.mxu0  ;;  %v794_v46 = vpop.f32.mrf.mxu1 }
 0x182   : > { %924 = vst [vmem:[%s1464_s27 + $0x78] sm:$0xff] %v698_v45  ;;  %956 = vst [vmem:[%s1464_s27 + $0x178] sm:$0xff] %v794_v46 }
 0x183   : > { %v702_v47 = vpop.f32.mrf.mxu0  ;;  %v798_v48 = vpop.f32.mrf.mxu1 }
 0x184   : > { %925 = vst [vmem:[%s1464_s27 + $0x80] sm:$0xff] %v702_v47  ;;  %957 = vst [vmem:[%s1464_s27 + $0x180] sm:$0xff] %v798_v48 }
 0x185   : > { %v704_v49 = vpop.f32.mrf.mxu0  ;;  %v800_v50 = vpop.f32.mrf.mxu1 }
 0x186   : > { %926 = vst [vmem:[%s1464_s27 + $0x88] sm:$0xff] %v704_v49  ;;  %958 = vst [vmem:[%s1464_s27 + $0x188] sm:$0xff] %v800_v50 }
 0x187   : > { %v708_v51 = vpop.f32.mrf.mxu0  ;;  %v804_v52 = vpop.f32.mrf.mxu1 }
 0x188   : > { %927 = vst [vmem:[%s1464_s27 + $0x90] sm:$0xff] %v708_v51  ;;  %959 = vst [vmem:[%s1464_s27 + $0x190] sm:$0xff] %v804_v52 }
 0x189   : > { %v710_v53 = vpop.f32.mrf.mxu0  ;;  %v806_v54 = vpop.f32.mrf.mxu1 }
 0x18a   : > { %928 = vst [vmem:[%s1464_s27 + $0x98] sm:$0xff] %v710_v53  ;;  %960 = vst [vmem:[%s1464_s27 + $0x198] sm:$0xff] %v806_v54 }
 0x18b   : > { %v714_v55 = vpop.f32.mrf.mxu0  ;;  %v810_v56 = vpop.f32.mrf.mxu1 }
 0x18c   : > { %929 = vst [vmem:[%s1464_s27 + $0xa0] sm:$0xff] %v714_v55  ;;  %961 = vst [vmem:[%s1464_s27 + $0x1a0] sm:$0xff] %v810_v56 }
 0x18d   : > { %v716_v57 = vpop.f32.mrf.mxu0  ;;  %v812_v58 = vpop.f32.mrf.mxu1 }
 0x18e   : > { %930 = vst [vmem:[%s1464_s27 + $0xa8] sm:$0xff] %v716_v57  ;;  %962 = vst [vmem:[%s1464_s27 + $0x1a8] sm:$0xff] %v812_v58 }
 0x18f   : > { %v720_v59 = vpop.f32.mrf.mxu0  ;;  %v816_v60 = vpop.f32.mrf.mxu1 }
 0x190   : > { %931 = vst [vmem:[%s1464_s27 + $0xb0] sm:$0xff] %v720_v59  ;;  %963 = vst [vmem:[%s1464_s27 + $0x1b0] sm:$0xff] %v816_v60 }
 0x191   : > { %v722_v61 = vpop.f32.mrf.mxu0  ;;  %v818_v62 = vpop.f32.mrf.mxu1 }
 0x192   : > { %932 = vst [vmem:[%s1464_s27 + $0xb8] sm:$0xff] %v722_v61  ;;  %964 = vst [vmem:[%s1464_s27 + $0x1b8] sm:$0xff] %v818_v62 }
 0x193   : > { %v726_v63 = vpop.f32.mrf.mxu0  ;;  %v822_v0 = vpop.f32.mrf.mxu1 }
 0x194   : > { %933 = vst [vmem:[%s1464_s27 + $0xc0] sm:$0xff] %v726_v63  ;;  %965 = vst [vmem:[%s1464_s27 + $0x1c0] sm:$0xff] %v822_v0 }
 0x195   : > { %v728_v1 = vpop.f32.mrf.mxu0  ;;  %v824_v2 = vpop.f32.mrf.mxu1 }
 0x196   : > { %934 = vst [vmem:[%s1464_s27 + $0xc8] sm:$0xff] %v728_v1  ;;  %966 = vst [vmem:[%s1464_s27 + $0x1c8] sm:$0xff] %v824_v2 }
 0x197   : > { %v732_v3 = vpop.f32.mrf.mxu0  ;;  %v828_v4 = vpop.f32.mrf.mxu1 }
 0x198   : > { %935 = vst [vmem:[%s1464_s27 + $0xd0] sm:$0xff] %v732_v3  ;;  %967 = vst [vmem:[%s1464_s27 + $0x1d0] sm:$0xff] %v828_v4 }
 0x199   : > { %v734_v5 = vpop.f32.mrf.mxu0  ;;  %v830_v6 = vpop.f32.mrf.mxu1 }
 0x19a   : > { %936 = vst [vmem:[%s1464_s27 + $0xd8] sm:$0xff] %v734_v5  ;;  %968 = vst [vmem:[%s1464_s27 + $0x1d8] sm:$0xff] %v830_v6 }
 0x19b   : > { %v738_v7 = vpop.f32.mrf.mxu0  ;;  %v834_v9 = vpop.f32.mrf.mxu1 }
 0x19c   : > { %937 = vst [vmem:[%s1464_s27 + $0xe0] sm:$0xff] %v738_v7  ;;  %969 = vst [vmem:[%s1464_s27 + $0x1e0] sm:$0xff] %v834_v9 }
 0x19d   : > { %v740_v10 = vpop.f32.mrf.mxu0  ;;  %v836_v11 = vpop.f32.mrf.mxu1 }
 0x19e   : > { %938 = vst [vmem:[%s1464_s27 + $0xe8] sm:$0xff] %v740_v10  ;;  %970 = vst [vmem:[%s1464_s27 + $0x1e8] sm:$0xff] %v836_v11 }
 0x19f   : > { %v744_v12 = vpop.f32.mrf.mxu0  ;;  %v840_v13 = vpop.f32.mrf.mxu1 }
 0x1a0   : > { %939 = vst [vmem:[%s1464_s27 + $0xf0] sm:$0xff] %v744_v12  ;;  %971 = vst [vmem:[%s1464_s27 + $0x1f0] sm:$0xff] %v840_v13 }
 0x1a1   : > { %v746_v14 = vpop.f32.mrf.mxu0  ;;  %v842_v15 = vpop.f32.mrf.mxu1 }
 0x1a2   : > { %940 = vst [vmem:[%s1464_s27 + $0xf8] sm:$0xff] %v746_v14  ;;  %972 = vst [vmem:[%s1464_s27 + $0x1f8] sm:$0xff] %v842_v15 }
 0x1a3 PF: > { %s13_s15 = sadd.s32 1, %s1289_s15   ;;  %s1556_s9 = smov %s1269_s10 }
 0x1a4   : > { %p10_p12 = scmp.ge.s32.totalorder %s13_s15, 8   ;;  %s1557_s10 = smov %s1359_s22 }
 0x1a5   : > { %s1558_s11 = smov %s1281_s13  ;;  %s1559_s12 = smov %s1285_s14 }
 0x1a6   : > { %s1560_s13 = smov %s1563_s16  ;;  %s1561_s14 = smov %s1567_s17 }
 0x1a7   :  { %12 = sbr.rel (!%p10_p12) target bundleno = 4 (0x4), region = 98 }

// kernel: custom-call.2
= control target key start
LH: loop header
LB: loop body
LE: loop exit
PB: predicated region body
PF: predicated region fallthrough
CT: control target
= control target key end

     0   :  { %s1724_s30 = smov 0   ;;  %s1726_s10 = smov 0   ;;  %s2051_s0 = inlined_call_operand.vmem [shape: f32[192,4,4], index: 0, kind: input, shape index: {}]   ;;  %s2052_s1 = inlined_call_operand.vmem [shape: f32[192,4,4], index: 1, kind: input, shape index: {}]   ;;  %s2053_s2 = inlined_call_operand.vmem [shape: f32[192,4,4], index: 2, kind: input, shape index: {}]   ;;  %s2054_s3 = inlined_call_operand.vmem [shape: f32[192,4,4], index: 3, kind: input, shape index: {}]   ;;  %s2055_s4 = inlined_call_operand.vmem [shape: f32[192,4], index: 4, kind: output, shape index: {0}]   ;;  %s2056_s5 = inlined_call_operand.vmem [shape: f32[192,4], index: 5, kind: output, shape index: {1}]   ;;  %s2057_s6 = inlined_call_operand.vmem [shape: f32[192,4,4], index: 6, kind: output, shape index: {2}]   ;;  %s2058_s7 = inlined_call_operand.vmem [shape: f32[192,4,4], index: 7, kind: output, shape index: {3}]   ;;  %s2059_s8 = inlined_call_operand.vmem [shape: f32[192,4,4], index: 8, kind: output, shape index: {4}]   ;;  %s2060_s9 = inlined_call_operand.vmem [shape: f32[192,4,4], index: 9, kind: output, shape index: {5}]  }
   0x1   :  { %s1728_s11 = smov 0  }
   0x2 LB: > { %s1740_s12 = sadd.s32 4294967295, %s1661_s11   ;;  %s1743_s13 = sadd.s32 1, %s1661_s11   ;;  %s1661_s11 = sphi %s1728_s11, %s2079_s11   ;;  %s1657_s10 = sphi %s1726_s10, %s2078_s10   ;;  %s1653_s30 = sphi %s1724_s30, %s2077_s30  }
   0x3   : > { %s20_s14 = sshrl.u32 %s1661_s11, 3  ;;  %s21_s15 = sshrl.u32 %s1743_s13, 3 }
   0x4   : > { %s22_s16 = ssub.s32 %s20_s14, %s21_s15  ;;  %s25_s17 = sadd.s32 1, %s1657_s10 }
   0x5   : > { %p23_p0 = scmp.eq.s32.totalorder %s22_s16, 0  ;;  %p35_p1 = scmp.ne.s32.totalorder %s1657_s10, %s1653_s30 }
   0x6   : > { %p36_p2 = scmp.eq.s32.totalorder %s1740_s12, 191  ;;  %p1522_p4 = scmp.ge.s32.totalorder %s1661_s11, 192 }
   0x7   : > { %s1752_s18 = scalar_select %p23_p0, %s1657_s10, %s25_s17  }
   0x8   : > { %p1754_p3 = por %p36_p2, %p35_p1  ;;  %86 = sbr.rel (%p1522_p4) target bundleno = 18 (0x12), region = 16 }
   0x9   : > { %2061 = sst [smem:[#allocation31_spill]] %s1752_s18  ;;  %s88_s20 = sand.u32 (!%p1522_p4), 1, %s1661_s11  }
   0xa   : > { %s1524_s21 = sshll.u32 (!%p1522_p4), %s1661_s11, 2  ;;  %s1523_s22 = sshll.u32 (!%p1522_p4), %s88_s20, 2 }
   0xb   : > { %s92_s25 = scalar_lea.vmem (!%p1522_p4), %s2051_s0, %s1524_s21  ;;  %s90_s26 = scalar_lea.vmem (!%p1522_p4), [#allocation1], %s1523_s22 }
   0xc   : > { %s131_s29 = scalar_lea.vmem (!%p1522_p4), %s2052_s1, %s1524_s21  ;;  %s170_s16 = scalar_lea.vmem (!%p1522_p4), %s2053_s2, %s1524_s21 }
   0xd   : > { %v109_v0 = vld [vmem:[%s92_s25] sm:$0xf]  ;;  %s129_s17 = scalar_lea.vmem [#allocation3], %s1523_s22  ;;  %s209_s23 = scalar_lea.vmem %s2054_s3, %s1524_s21 }
   0xe   : > { %110 = vst [vmem:[%s90_s26] sm:$0xf] %v109_v0  ;;  %v148_v1 = vld [vmem:[%s131_s29] sm:$0xf]  ;;  %s168_s24 = scalar_lea.vmem [#allocation5], %s1523_s22  ;;  %s207_s25 = scalar_lea.vmem [#allocation7], %s1523_s22 }
   0xf   : > { %149 = vst [vmem:[%s129_s17] sm:$0xf] %v148_v1  ;;  %v187_v2 = vld [vmem:[%s170_s16] sm:$0xf] }
  0x10   : > { %188 = vst [vmem:[%s168_s24] sm:$0xf] %v187_v2  ;;  %v226_v3 = vld [vmem:[%s209_s23] sm:$0xf] }
  0x11   : > { %227 = vst [vmem:[%s207_s25] sm:$0xf] %v226_v3 }
  0x12 PF: > { %p1531_p5 = scmp.ge.s32.totalorder %s1661_s11, 1  ;;  %p244_p6 = scmp.lt.s32.totalorder %s1661_s11, 193 }
  0x14   : > { %p245_p7 = pnand %p1531_p5, %p244_p6 }
  0x16   : > { %248 = sbr.rel (%p245_p7) target bundleno = 986 (0x3da), region = 140 }
  0x1b   : > { %s267_s26 = sand.u32 1, %s1740_s12   ;;  %s285_s27 = sand.u32 1, %s1653_s30   ;;  %v349_v4 = vlaneseq  ;;  %v1671_v5 = vmov 0.0  }
  0x1c   : > { %s1777_s28 = sshll.u32 %s267_s26, 2  ;;  %s1779_s18 = sshll.u32 %s285_s27, 3  ;;  %344 = vst [vmem:[#allocation10] sm:$0xff] %v1671_v5  ;;  %345 = vst [vmem:[#allocation12] sm:$0xff] %v1671_v5 }
  0x1d   : > { %346 = vst [vmem:[#allocation14] sm:$0xff] %v1671_v5  ;;  %347 = vst [vmem:[#allocation16] sm:$0xff] %v1671_v5  ;;  %v1781_v6 = vand.u32 127, %v349_v4  ;;  %v1783_v7 = vshrl.u32 %v349_v4, 7  ;;  %s269_s11 = scalar_lea.vmem [#allocation1], %s1777_s28  ;;  %s273_s30 = scalar_lea.vmem [#allocation3], %s1777_s28 }
  0x1e   : > { %v313_v8 = vld [vmem:[%s269_s11] sm:$0xf]  ;;  %v318_v9 = vld [vmem:[%s273_s30] sm:$0xf]  ;;  %s277_s21 = scalar_lea.vmem [#allocation5], %s1777_s28  ;;  %s281_s22 = scalar_lea.vmem [#allocation7], %s1777_s28 }
  0x1f   : > { %314 = vst [vmem:[#allocation0] sm:$0xf] %v313_v8  ;;  %319 = vst [vmem:[#allocation2] sm:$0xf] %v318_v9  ;;  %v323_v10 = vld [vmem:[%s277_s21] sm:$0xf]  ;;  %v351_v6 = vmov %v1781_v6  ;;  %v354_v7 = vmov %v1783_v7 }
  0x20   : > { %v328_v11 = vld [vmem:[%s281_s22] sm:$0xf]  ;;  %324 = vst [vmem:[#allocation4] sm:$0xf] %v323_v10  ;;  %v364_v6 = vmov %v1781_v6  ;;  %v367_v7 = vmov %v1783_v7  ;;  %s332_s29 = smov [#allocation18]  ;;  %s335_s14 = smov [#allocation19]  ;;  %vm358_vm0 = vcmp.eq.s32.totalorder %v354_v7, %v351_v6 }
  0x21   : > { %329 = vst [vmem:[#allocation6] sm:$0xf] %v328_v11  ;;  %vm371_vm1 = vcmp.eq.s32.totalorder %v367_v7, %v364_v6  ;;  %s348_s15 = smov [#allocation10]  ;;  %s361_s16 = smov [#allocation16]  ;;  %vm1411_vm2 = vcmp.lt.s32.totalorder %v1781_v6, 4  ;;  %v1403_v6 = vmov %v1781_v6  ;;  %v1406_v7 = vmov %v1783_v7 }
  0x22   : > { %s338_s17 = smov [#allocation20]  ;;  %s341_s20 = smov [#allocation21]  ;;  %vm1416_vm3 = vcmp.eq.s32.totalorder %v1406_v7, %v1403_v6  ;;  %v1454_v6 = vmov %v1781_v6  ;;  %v1423_v7 = vmov %v1783_v7 }
  0x23   : > { %v355_v12 = vld [vmem:[%s348_s15] sm:$0xf]  ;;  %s1407_s30 = smov [#allocation18]  ;;  %s1424_s21 = smov [#allocation19]  ;;  %v1420_v6 = vmov %v1781_v6  ;;  %v1457_v7 = vmov %v1783_v7 }
  0x24   : > { %v368_v13 = vld [vmem:[%s361_s16] sm:$0xf]  ;;  %v359_v16 = vsel %vm358_vm0, 1.0, %v355_v12  ;;  %s1441_s22 = smov [#allocation20]  ;;  %v1437_v6 = vmov %v1781_v6  ;;  %v1440_v7 = vmov %v1783_v7  ;;  %vm1467_vm4 = vcmp.eq.s32.totalorder %v1457_v7, %v1454_v6 }
  0x25   : > { %v372_v17 = vsel %vm371_vm1, 1.0, %v368_v13  ;;  %360 = vst [vmem:[%s348_s15] sm:$0xf] %v359_v16 }
  0x26   : > { %v333_v14 = vld [vmem:[#allocation0] sm:$0xff]  ;;  %v336_v15 = vld [vmem:[#allocation2] sm:$0xff]  ;;  %373 = vst [vmem:[%s361_s16] sm:$0xf] %v372_v17 }
  0x27   : > { %334 = vst [vmem:[%s332_s29] sm:$0xff] %v333_v14  ;;  %337 = vst [vmem:[%s335_s14] sm:$0xff] %v336_v15  ;;  %v339_v18 = vld [vmem:[#allocation4] sm:$0xff]  ;;  %s1458_s29 = smov [#allocation21] }
  0x28   : > { %v342_v19 = vld [vmem:[#allocation6] sm:$0xff]  ;;  %340 = vst [vmem:[%s338_s17] sm:$0xff] %v339_v18 }
  0x29   : > { %343 = vst [vmem:[%s341_s20] sm:$0xff] %v342_v19 }
  0x2e   : > { %v1413_v20 = vld [vmem:[%s1407_s30] sm:$0xf] }
  0x2f   : > { %v1430_v21 = vld [vmem:[%s1424_s21] sm:$0xf]  ;;  %v1414_v22 = vsel %vm1411_vm2, %v1413_v20, 0.0 }
  0x30   : > { %v1431_v23 = vsel %vm1411_vm2, %v1430_v21, 0.0  ;;  %v1447_v24 = vld [vmem:[%s1441_s22] sm:$0xf]  ;;  %v1415_v26 = vmul.f32 %v1414_v22, %v1414_v22 }
  0x31   : > { %v1464_v25 = vld [vmem:[%s1458_s29] sm:$0xf]  ;;  %v1432_v27 = vmul.f32 %v1431_v23, %v1431_v23  ;;  %v1448_v28 = vsel %vm1411_vm2, %v1447_v24, 0.0 }
  0x32   : > { %v1465_v29 = vsel %vm1411_vm2, %v1464_v25, 0.0  ;;  %v1449_v30 = vmul.f32 %v1448_v28, %v1448_v28  ;;  %v1417_v33 = vsel %vm1416_vm3, 0.0, %v1415_v26 }
  0x33   : > { %v1434_v31 = vadd.f32 %v1432_v27, %v1415_v26  ;;  %v1466_v32 = vmul.f32 %v1465_v29, %v1465_v29  ;;  %v1433_v34 = vadd.f32 %v1432_v27, %v1417_v33 }
  0x35   : > { %v1451_v35 = vadd.f32 %v1449_v30, %v1434_v31  ;;  %v1450_v36 = vadd.f32 %v1449_v30, %v1433_v34  ;;  %v1468_v37 = vsel %vm1467_vm4, 0.0, %v1466_v32 }
  0x37   : > { %v1470_v38 = vadd.f32 %v1466_v32, %v1451_v35  ;;  %v1469_v39 = vadd.f32 %v1468_v37, %v1450_v36 }
  0x39   : > { %1471 = vadd.xlane.f32.xlu0 %v1470_v38 }
  0x3d   : > { %1479 = vadd.xlane.f32.xlu0 %v1469_v39 }
  0xc2   : > { %v1472_v40 = vpop.xlane.xlu0 %1471 }
  0xc3   : > { %v1473_v41 = vrot.slane %v1472_v40, 4 }
  0xc5   : > { %v1474_v42 = vadd.f32 %v1473_v41, %v1472_v40 }
  0xc6   : > { %v1480_v43 = vpop.xlane.xlu0 %1479 }
  0xc7   : > { %v1475_v44 = vrot.slane %v1474_v42, 2  ;;  %v1481_v45 = vrot.slane %v1480_v43, 4 }
  0xc9   : > { %v1482_v46 = vadd.f32 %v1481_v45, %v1480_v43  ;;  %v1476_v47 = vadd.f32 %v1475_v44, %v1474_v42 }
  0xcb   : > { %v1483_v48 = vrot.slane %v1482_v46, 2  ;;  %v1477_v50 = vrot.slane %v1476_v47, 1 }
  0xcd   : > { %v1484_v49 = vadd.f32 %v1483_v48, %v1482_v46  ;;  %v1478_v53 = vadd.f32 %v1477_v50, %v1476_v47 }
  0xcf   : > { %v1485_v51 = vrot.slane %v1484_v49, 1 }
  0xd1   : > { %v1486_v52 = vadd.f32 %v1485_v51, %v1484_v49 }
  0xd3   : > { %1572 = vpush %v1486_v52 }
  0xd4   : > { %1574 = vpush %v1478_v53 }
 0x104   : > { %s1573_s14 = spop %1572 }
 0x105   : > { %s1575_s15 = spop %1574 }
 0x106   : > { %s1489_s16 = smul.f32 1e-10, %s1575_s15 }
 0x108   : > { %p1490_p8 = scmp.le.f32.partialorder %s1573_s14, %s1489_s16 }
 0x109   : > { %s1817_s17 = smov (!%p1490_p8), 0  }
 0x10a   : > { %1493 = sbr.rel (%p1490_p8) target bundleno = 948 (0x3b4), region = 475 }
 0x10f LB: >> { %s1822_s20 = smov 0   ;;  %s1665_s17 = sphi %s1817_s17, %s2063_s17  }
 0x110 LB: >>> { %s478_s30 = smov [#allocation18]  ;;  %v482_v6 = vmov %v1781_v6  ;;  %v485_v7 = vmov %v1783_v7  ;;  %s498_s21 = smov [#allocation19]  ;;  %vm801_vm14 = vcmp.eq.s32.totalorder %v1783_v7, 0  ;;  %vm813_vm15 = vcmp.eq.s32.totalorder %v1783_v7, 3  ;;  %s1669_s20 = sphi %s1822_s20, %s477_s20  }
 0x111   : >>> { %v502_v6 = vmov %v1781_v6  ;;  %v505_v7 = vmov %v1783_v7  ;;  %v486_v54 = vld [vmem:[%s478_s30] sm:$0xf]  ;;  %vm489_vm5 = vcmp.eq.s32.totalorder %v485_v7, %v482_v6  ;;  %s518_s22 = smov [#allocation21]  ;;  %s479_s29 = smov [#allocation22] }
 0x112   : >>> { %vm509_vm6 = vcmp.eq.s32.totalorder %v505_v7, %v502_v6  ;;  %v522_v6 = vmov %v1781_v6  ;;  %v525_v7 = vmov %v1783_v7  ;;  %v490_v55 = vsel %vm489_vm5, %v486_v54, 0.0  ;;  %v506_v56 = vld [vmem:[%s498_s21] sm:$0xf]  ;;  %s499_s14 = smov [#allocation23]  ;;  %s519_s15 = smov [#allocation24] }
 0x113   : >>> { %vm529_vm7 = vcmp.eq.s32.totalorder %v525_v7, %v522_v6  ;;  %v491_v57 = vrot.slane %v490_v55, 4  ;;  %v510_v58 = vsel %vm509_vm6, %v506_v56, 0.0  ;;  %v526_v59 = vld [vmem:[%s518_s22] sm:$0xf]  ;;  %s542_s16 = smov [#allocation23]  ;;  %s540_s30 = smov [#allocation22]  ;;  %v591_v6 = vmov %v1781_v6 }
 0x114   : >>> { %v511_v60 = vrot.slane %v510_v58, 4  ;;  %v530_v61 = vsel %vm529_vm7, %v526_v59, 0.0  ;;  %s544_s21 = smov [#allocation24]  ;;  %s579_s22 = smov [#allocation25]  ;;  %v594_v7 = vmov %v1783_v7  ;;  %v606_v6 = vmov %v1781_v6 }
 0x115   : >>> { %v492_v62 = vadd.f32 %v491_v57, %v490_v55  ;;  %v531_v63 = vrot.slane %v530_v61, 4  ;;  %v609_v7 = vmov %v1783_v7  ;;  %vm596_vm12 = vcmp.eq.s32.totalorder %v594_v7, %v591_v6  ;;  %s1841_s24 = smov [#allocation20]  ;;  %s1847_s23 = smov [#allocation12] }
 0x116   : >>> { %v512_v0 = vadd.f32 %v511_v60, %v510_v58  ;;  %vm611_vm13 = vcmp.eq.s32.totalorder %v609_v7, %v606_v6  ;;  %s841_s11 = smov [#allocation29]  ;;  %s1853_s27 = smov [#allocation16]  ;;  %v627_v55 = vld [vmem:[%s1841_s24] sm:$0xf]  ;;  %v704_v6 = vmov %v1781_v6  ;;  %v707_v7 = vmov %v1783_v7 }
 0x117   : >>> { %v493_v1 = vrot.slane %v492_v62, 2  ;;  %v532_v2 = vadd.f32 %v531_v63, %v530_v61  ;;  %v850_v58 = vld [vmem:[%s1847_s23] sm:$0xf]  ;;  %s619_s26 = smov [#allocation30]  ;;  %s843_s25 = smov [#allocation30]  ;;  %v718_v6 = vmov %v1781_v6  ;;  %v721_v7 = vmov %v1783_v7 }
 0x118   : >>> { %v513_v3 = vrot.slane %v512_v0, 2  ;;  %v852_v61 = vld [vmem:[%s1853_s27] sm:$0xf]  ;;  %vm711_vm0 = vcmp.eq.s32.totalorder %v707_v7, %v704_v6  ;;  %v677_v6 = vmov %v1781_v6  ;;  %v680_v7 = vmov %v1783_v7  ;;  %s477_s20 = sadd.s32 1, %s1669_s20  }
 0x119   : >>> { %v494_v4 = vadd.f32 %v493_v1, %v492_v62  ;;  %v533_v5 = vrot.slane %v532_v2, 2  ;;  %v691_v6 = vmov %v1781_v6  ;;  %v694_v7 = vmov %v1783_v7  ;;  %p474_p9 = scmp.ge.s32.totalorder %s477_s20, 7  }
 0x11a   : >>> { %v514_v8 = vadd.f32 %v513_v3, %v512_v0  ;;  %vm726_vm1 = vcmp.eq.s32.totalorder %v721_v7, %v718_v6  ;;  %vm685_vm3 = vcmp.eq.s32.totalorder %v680_v7, %v677_v6  ;;  %vm698_vm4 = vcmp.eq.s32.totalorder %v694_v7, %v691_v6 }
 0x11b   : >>> { %v495_v9 = vrot.slane %v494_v4, 1  ;;  %v534_v10 = vadd.f32 %v533_v5, %v532_v2  ;;  %vm740_vm5 = vcmp.eq.s32.totalorder %v1781_v6, 0  ;;  %vm744_vm6 = vcmp.eq.s32.totalorder %v1781_v6, 1 }
 0x11c   : >>> { %v515_v11 = vrot.slane %v514_v8, 1  ;;  %vm757_vm7 = vcmp.eq.s32.totalorder %v1781_v6, 3  ;;  %v378_v6 = vmov (%p474_p9), %v1781_v6  ;;  %v381_v7 = vmov (%p474_p9), %v1783_v7 }
 0x11d   : >>> { %v496_v12 = vadd.f32 %v495_v9, %v494_v4  ;;  %v535_v13 = vrot.slane %v534_v10, 1  ;;  %v431_v6 = vmov (%p474_p9), %v1781_v6 }
 0x11e   : >>> { %v516_v14 = vadd.f32 %v515_v11, %v514_v8 }
 0x11f   : >>> { %497 = vst [vmem:[%s479_s29] sm:$0x1] %v496_v12  ;;  %v536_v15 = vadd.f32 %v535_v13, %v534_v10  ;;  %s581_s29 = smov [#allocation26] }
 0x120   : >>> { %517 = vst [vmem:[%s499_s14] sm:$0x1] %v516_v14  ;;  %s538_s14 = smov [#allocation27] }
 0x121   : >>> { %537 = vst [vmem:[%s519_s15] sm:$0x1] %v536_v15  ;;  %s539_s15 = smov [#allocation28]  ;;  %s583_s14 = smov %s538_s14 }
 0x122   : >>> { %s585_s15 = smov %s539_s15 }
 0x126   : >>> { %v541_v18 = vld [vmem:[%s540_s30] sm:$0xff]  ;;  %s602_s30 = smov [#allocation28] }
 0x127   : >>> { %v543_v16 = vld [vmem:[%s542_s16] sm:$0xff]  ;;  %v564_v33 = vand.u32 2147483647, %v541_v18  ;;  %s587_s16 = smov [#allocation27] }
 0x128   : >>> { %v547_v17 = vmul.f32 2.0, %v543_v16  ;;  %v545_v19 = vld [vmem:[%s544_s21] sm:$0xff]  ;;  %v565_v36 = vand.u32 2147483647, %v543_v16  ;;  %s600_s21 = smov [#allocation29] }
 0x129   : >>> { %v546_v20 = vsub.f32 %v545_v19, %v541_v18  ;;  %v566_v34 = vand.u32 2147483647, %v545_v19 }
 0x12a   : >>> { %1623 = vrcp.f32 %v547_v17 }
 0x12b   : >>> { %v567_v35 = vmin.f32 %v564_v33, %v566_v34 }
 0x12d   : >>> { %v568_v37 = vmul.f32 1.1920929e-08, %v567_v35 }
 0x12f   : >>> { %vm569_vm11 = vcmp.le.f32.partialorder %v565_v36, %v568_v37 }
 0x137   : >>> { %v1624_v21 = vpop.eup %1623 }
 0x138   : >>> { %v549_v22 = vmul.f32 %v1624_v21, %v546_v20 }
 0x13a   : >>> { %v551_v23 = vmul.f32 %v549_v22, %v549_v22  ;;  %vm550_vm10 = vcmp.ge.f32.partialorder %v549_v22, 0.0 }
 0x13c   : >>> { %v552_v24 = vadd.f32 1.0, %v551_v23 }
 0x13e   : >>> { %1625 = vrsqrt.f32 %v552_v24  ;;  %vm555_vm8 = vcmp.eq.f32.partialorder %v552_v24, inf  ;;  %v558_v26 = vand.u32 2147483648, %v552_v24  ;;  %vm557_vm9 = vcmp.eq.f32.partialorder %v552_v24, 0.0 }
 0x14b   : >>> { %v1626_v25 = vpop.eup %1625 }
 0x14c   : >>> { %v554_v27 = vmul.f32 %v1626_v25, %v552_v24 }
 0x14e   : >>> { %v556_v28 = vsel %vm555_vm8, %v552_v24, %v554_v27  ;;  %vm393_vm8 = vcmp.eq.s32.totalorder (%p474_p9), %v381_v7, %v378_v6  ;;  %v434_v7 = vmov (%p474_p9), %v1783_v7  ;;  %v397_v6 = vmov (%p474_p9), %v1781_v6 }
 0x14f   : >>> { %v559_v29 = vsel %vm557_vm9, %v558_v26, %v556_v28  ;;  %v400_v7 = vmov (%p474_p9), %v1783_v7  ;;  %v414_v6 = vmov (%p474_p9), %v1781_v6  ;;  %vm446_vm9 = vcmp.eq.s32.totalorder (%p474_p9), %v434_v7, %v431_v6 }
 0x150   : >>> { %v560_v30 = vxor.u32 2147483648, %v559_v29  ;;  %v417_v7 = vmov (%p474_p9), %v1783_v7 }
 0x152   : >>> { %v561_v31 = vsel %vm550_vm10, %v559_v29, %v560_v30 }
 0x153   : >>> { %v562_v32 = vadd.f32 %v561_v31, %v549_v22 }
 0x155   : >>> { %1627 = vrcp.f32 %v562_v32 }
 0x162   : >>> { %v1628_v38 = vpop.eup %1627 }
 0x163   : >>> { %v570_v39 = vsel %vm569_vm11, 0.0, %v1628_v38 }
 0x164   : >>> { %v571_v40 = vmul.f32 %v570_v39, %v570_v39  ;;  %v575_v41 = vmul.f32 %v570_v39, %v543_v16 }
 0x166   : >>> { %v572_v42 = vadd.f32 1.0, %v571_v40  ;;  %v576_v43 = vsub.f32 %v541_v18, %v575_v41  ;;  %v578_v44 = vadd.f32 %v575_v41, %v545_v19 }
 0x168   : >>> { %1629 = vrsqrt.f32 %v572_v42  ;;  %580 = vst [vmem:[%s579_s22] sm:$0xff] %v576_v43  ;;  %582 = vst [vmem:[%s581_s29] sm:$0xff] %v578_v44  ;;  %s617_s22 = smov [#allocation29]  ;;  %s1837_s29 = smov [#allocation18] }
 0x169   : >>> { %v625_v53 = vld [vmem:[%s1837_s29] sm:$0xf] }
 0x175   : >>> { %v1630_v45 = vpop.eup %1629 }
 0x176   : >>> { %584 = vst [vmem:[%s583_s14] sm:$0xff] %v1630_v45  ;;  %v574_v46 = vmul.f32 %v1630_v45, %v570_v39  ;;  %s615_s14 = smov [#allocation30] }
 0x178   : >>> { %586 = vst [vmem:[%s585_s15] sm:$0xff] %v574_v46  ;;  %s1839_s15 = smov [#allocation19] }
 0x179   : >>> { %v626_v54 = vld [vmem:[%s1839_s15] sm:$0xf] }
 0x17d   : >>> { %v588_v47 = vld [vmem:[%s587_s16] ss:$0 sm:$0xff]  ;;  %s1843_s16 = smov [#allocation21] }
 0x17e   : >>> { %v597_v48 = vsel %vm596_vm12, %v588_v47, 0.0  ;;  %v628_v56 = vld [vmem:[%s1843_s16] sm:$0xf] }
 0x17f   : >>> { %598 = vadd.xlane.f32.xlu0 %v597_v48  ;;  %v603_v49 = vld [vmem:[%s602_s30] ss:$0 sm:$0xff]  ;;  %s1845_s30 = smov [#allocation10] }
 0x180   : >>> { %v612_v50 = vsel %vm611_vm13, %v603_v49, 0.0  ;;  %v849_v57 = vld [vmem:[%s1845_s30] sm:$0xf] }
 0x183   : >>> { %613 = vadd.xlane.f32.xlu0 %v612_v50 }
 0x208   : >>> { %v599_v51 = vpop.xlane.xlu0 %598 }
 0x209   : >>> { %601 = vst [vmem:[%s600_s21] sm:$0xff] %v599_v51  ;;  %s1849_s21 = smov [#allocation14] }
 0x20a   : >>> { %v851_v59 = vld [vmem:[%s1849_s21] sm:$0xf] }
 0x20c   : >>> { %v614_v52 = vpop.xlane.xlu0 %613 }
 0x20d   : >>> { %616 = vst [vmem:[%s615_s14] sm:$0xff] %v614_v52  ;;  %s1873_s14 = smov [#allocation21] }
 0x210   : >>> { %v618_v60 = vld [vmem:[%s617_s22] sm:$0xff]  ;;  %s1871_s22 = smov [#allocation20] }
 0x211   : >>> { %v842_v62 = vld [vmem:[%s841_s11] sm:$0xff]  ;;  %v629_v63 = vmul.f32 %v625_v53, %v618_v60  ;;  %v632_v0 = vmul.f32 %v626_v54, %v618_v60  ;;  %v636_v1 = vmul.f32 %v627_v55, %v618_v60  ;;  %v639_v2 = vmul.f32 %v628_v56, %v618_v60  ;;  %s1869_s11 = smov [#allocation10] }
 0x212   : >>> { %v853_v3 = vmul.f32 %v849_v57, %v842_v62  ;;  %v856_v4 = vmul.f32 %v850_v58, %v842_v62  ;;  %v860_v5 = vmul.f32 %v851_v59, %v842_v62  ;;  %v863_v8 = vmul.f32 %v852_v61, %v842_v62 }
 0x214   : >>> { %v620_v9 = vld [vmem:[%s619_s26] sm:$0xff]  ;;  %s647_s26 = smov [#allocation28] }
 0x215   : >>> { %v844_v10 = vld [vmem:[%s843_s25] sm:$0xff]  ;;  %v630_v11 = vmul.f32 %v627_v55, %v620_v9  ;;  %v633_v12 = vmul.f32 %v628_v56, %v620_v9  ;;  %v635_v13 = vmul.f32 %v625_v53, %v620_v9  ;;  %v638_v14 = vmul.f32 %v626_v54, %v620_v9  ;;  %s645_s25 = smov [#allocation27] }
 0x216   : >>> { %v854_v15 = vmul.f32 %v851_v59, %v844_v10  ;;  %v857_v16 = vmul.f32 %v852_v61, %v844_v10  ;;  %v859_v17 = vmul.f32 %v849_v57, %v844_v10  ;;  %v862_v18 = vmul.f32 %v850_v58, %v844_v10  ;;  %v646_v27 = vld [vmem:[%s645_s25] ss:$0 sm:$0xff]  ;;  %s674_s25 = smov [#allocation25] }
 0x217   : >>> { %v631_v19 = vsub.f32 %v629_v63, %v630_v11  ;;  %v634_v20 = vsub.f32 %v632_v0, %v633_v12  ;;  %v637_v21 = vadd.f32 %v636_v1, %v635_v13  ;;  %v640_v22 = vadd.f32 %v639_v2, %v638_v14  ;;  %v648_v28 = vld [vmem:[%s647_s26] ss:$0 sm:$0xff]  ;;  %s673_s26 = smov [#allocation18] }
 0x218   : >>> { %v855_v23 = vsub.f32 %v853_v3, %v854_v15  ;;  %v858_v24 = vsub.f32 %v856_v4, %v857_v16  ;;  %v861_v25 = vadd.f32 %v860_v5, %v859_v17  ;;  %v864_v26 = vadd.f32 %v863_v8, %v862_v18  ;;  %v681_v63 = vld [vmem:[%s674_s25] ss:$0 sm:$0xff]  ;;  %s917_s25 = sadd.s32 (%p474_p9), 1, %s1665_s17  }
 0x219   : >>> { %642 = vst [vmem:[%s1839_s15] sm:$0xf] %v634_v20  ;;  %644 = vst [vmem:[%s1843_s16] sm:$0xf] %v640_v22  ;;  %s1875_s15 = smov [#allocation18]  ;;  %s715_s16 = smov [#allocation26] }
 0x21a   : >>> { %641 = vst [vmem:[%s1837_s29] sm:$0xf] %v631_v19  ;;  %643 = vst [vmem:[%s1841_s24] sm:$0xf] %v637_v21  ;;  %s1877_s24 = smov [#allocation14]  ;;  %s1885_s29 = smov [#allocation19]  ;;  %v722_v59 = vld [vmem:[%s715_s16] ss:$0 sm:$0xff] }
 0x21b   : >>> { %865 = vst [vmem:[%s1845_s30] sm:$0xf] %v855_v23  ;;  %866 = vst [vmem:[%s1847_s23] sm:$0xf] %v858_v24  ;;  %s1879_s23 = smov [#allocation12]  ;;  %s701_s30 = smov [#allocation20] }
 0x21c   : >>> { %867 = vst [vmem:[%s1849_s21] sm:$0xf] %v861_v25  ;;  %868 = vst [vmem:[%s1853_s27] sm:$0xf] %v864_v26  ;;  %s1883_s27 = smov [#allocation16]  ;;  %s714_s21 = smov [#allocation21] }
 0x21d   : >>> { %s817_s16 = smov [#allocation19]  ;;  %p470_p10 = scmp.ge.s32.totalorder (%p474_p9), %s917_s25, 15 }
 0x21e   : >> { %s2063_s17 = smov (%p474_p9), %s917_s25 }
 0x220   : >>> { %v656_v30 = vld [vmem:[%s1873_s14] sm:$0xf] }
 0x221   : >>> { %v655_v29 = vld [vmem:[%s1871_s22] sm:$0xf]  ;;  %v664_v36 = vmul.f32 %v656_v30, %v648_v28  ;;  %v667_v42 = vmul.f32 %v656_v30, %v646_v27 }
 0x222   : >>> { %v653_v31 = vld [vmem:[%s1875_s15] sm:$0xf]  ;;  %v663_v35 = vmul.f32 %v655_v29, %v646_v27  ;;  %v666_v37 = vmul.f32 %v655_v29, %v648_v28 }
 0x223   : >>> { %v871_v32 = vld [vmem:[%s1869_s11] ss:$0 sm:$0xff]  ;;  %v1551_v34 = vld [vmem:[%s1869_s11 + $0x3] ss:$0 sm:$0xff]  ;;  %v657_v48 = vmul.f32 %v653_v31, %v646_v27  ;;  %v660_v49 = vmul.f32 %v653_v31, %v648_v28 }
 0x224   : >>> { %v1550_v33 = vld [vmem:[%s1869_s11 - $0x1] sm:$0xe]  ;;  %v1555_v45 = vld [vmem:[%s1879_s23 + $0x3] ss:$0 sm:$0xff]  ;;  %v665_v47 = vsub.f32 %v663_v35, %v664_v36  ;;  %v668_v53 = vadd.f32 %v667_v42, %v666_v37 }
 0x225   : >>> { %v878_v38 = vsel %vm801_vm14, %v871_v32, %v1550_v33  ;;  %v882_v39 = vld [vmem:[%s1877_s24] ss:$0 sm:$0xff]  ;;  %v1553_v40 = vld [vmem:[%s1877_s24 + $0x1] sm:$0x7] }
 0x226   : >>> { %v895_v41 = vld [vmem:[%s1879_s23] ss:$0 sm:$0xff]  ;;  %881 = vst [vmem:[%s1869_s11] sm:$0xf] %v878_v38  ;;  %v890_v43 = vsel %vm813_vm15, %v1551_v34, %v1553_v40  ;;  %v1557_v51 = vld [vmem:[%s1883_s27 + $0x1] sm:$0x7]  ;;  %671 = vst [vmem:[%s1871_s22] sm:$0xf] %v665_v47 }
 0x227   : >>> { %v1554_v44 = vld [vmem:[%s1879_s23 - $0x1] sm:$0xe]  ;;  %1552 = vst [vmem:[%s1869_s11 + $0x1] sm:$0x1] %v882_v39  ;;  %892 = vst [vmem:[%s1877_s24] sm:$0xf] %v890_v43  ;;  %v914_v54 = vsel %vm813_vm15, %v1555_v45, %v1557_v51  ;;  %s688_s11 = smov [#allocation19] }
 0x228   : >>> { %v906_v46 = vld [vmem:[%s1883_s27] ss:$0 sm:$0xff]  ;;  %v902_v50 = vsel %vm801_vm14, %v895_v41, %v1554_v44  ;;  %672 = vst [vmem:[%s1873_s14] sm:$0xf] %v668_v53  ;;  %s1927_s22 = smov [#allocation20]  ;;  %s1672_s14 = smov 1  }
 0x229   : >>> { %v654_v52 = vld [vmem:[%s1885_s29] sm:$0xf]  ;;  %905 = vst [vmem:[%s1879_s23] sm:$0xf] %v902_v50  ;;  %916 = vst [vmem:[%s1883_s27] sm:$0xf] %v914_v54  ;;  %s730_s24 = smov [#allocation19]  ;;  %s1930_s27 = smov [#allocation21] }
 0x22a   : >>> { %v658_v55 = vmul.f32 %v654_v52, %v648_v28  ;;  %v661_v56 = vmul.f32 %v654_v52, %v646_v27  ;;  %1556 = vst [vmem:[%s1879_s23 + $0x1] sm:$0x1] %v906_v46  ;;  %s1673_s23 = smov 127  }
 0x22c   : >>> { %v659_v57 = vsub.f32 %v657_v48, %v658_v55  ;;  %v662_v58 = vadd.f32 %v661_v56, %v660_v49 }
 0x22d   : >>> { %v708_v60 = vld [vmem:[%s701_s30] sm:$0xf] }
 0x22e   : >>> { %669 = vst [vmem:[%s1875_s15] sm:$0xf] %v659_v57  ;;  %670 = vst [vmem:[%s1885_s29] sm:$0xf] %v662_v58  ;;  %v712_v61 = vsel %vm711_vm0, 0.0, %v708_v60  ;;  %s729_s15 = smov [#allocation18]  ;;  %s793_s29 = smov [#allocation18] }
 0x22f   : >>> { %v723_v62 = vld [vmem:[%s714_s21] sm:$0xf]  ;;  %713 = vst [vmem:[%s701_s30] sm:$0xf] %v712_v61  ;;  %s794_s30 = smov [#allocation20] }
 0x230   : >>> { %v727_v0 = vsel %vm726_vm1, %v722_v59, %v723_v62 }
 0x231   : >>> { %728 = vst [vmem:[%s714_s21] sm:$0xf] %v727_v0  ;;  %s818_s21 = smov [#allocation21] }
 0x235   : >>> { %v682_v1 = vld [vmem:[%s673_s26] sm:$0xf] }
 0x236   : >>> { %v695_v2 = vld [vmem:[%s688_s11] sm:$0xf]  ;;  %v686_v3 = vsel %vm685_vm3, %v681_v63, %v682_v1 }
 0x237   : >>> { %v699_v4 = vsel %vm698_vm4, 0.0, %v695_v2  ;;  %687 = vst [vmem:[%s673_s26] sm:$0xf] %v686_v3  ;;  %v767_v5 = vld [vmem:[%s1927_s22] sm:$0xf]  ;;  %s382_s26 = smov (%p474_p9), [#allocation18] }
 0x238   : >>> { %700 = vst [vmem:[%s688_s11] sm:$0xf] %v699_v4  ;;  %768 = vrot.lane.b32.xlu0 %v767_v5, %s1672_s14  ;;  %v763_v11 = vld [vmem:[%s1930_s27] sm:$0xf]  ;;  %s401_s11 = smov (%p474_p9), [#allocation19] }
 0x239   : >>> { %v784_v12 = vld [vmem:[%s1930_s27] sm:$0xf] }
 0x23a   : >>> { %v766_v30 = vld [vmem:[%s1927_s22] sm:$0xf] }
 0x23e   : >>> { %v735_v8 = vld [vmem:[%s729_s15] sm:$0xf] }
 0x23f   : >>> { %736 = vrot.lane.b32.xlu1 %v735_v8, %s1672_s14  ;;  %v731_v9 = vld [vmem:[%s730_s24] sm:$0xf] }
 0x240   : >>> { %v752_v10 = vld [vmem:[%s730_s24] sm:$0xf] }
 0x241   : >>> { %v734_v18 = vld [vmem:[%s729_s15] sm:$0xf] }
 0x243   : >>> { %732 = vrot.lane.b32.xlu1 %v731_v9, %s1672_s14 }
 0x247   : >>> { %753 = vrot.lane.b32.xlu1 %v752_v10, %s1673_s23 }
 0x24b   : >>> { %764 = vrot.lane.b32.xlu1 %v763_v11, %s1672_s14  ;;  %s435_s14 = smov (%p474_p9), [#allocation21] }
 0x24f   : >>> { %785 = vrot.lane.b32.xlu1 %v784_v12, %s1673_s23 }
 0x2aa   : >>> { %v769_v20 = vpop.permute.xlu0 %768 }
 0x2ab   : >>> { %v773_v22 = vsel %vm740_vm5, %v767_v5, %v769_v20 }
 0x2b1   : >>> { %v737_v13 = vpop.permute.xlu1 %736 }
 0x2b2   : >>> { %v741_v14 = vsel %vm740_vm5, %v735_v8, %v737_v13 }
 0x2b5   : >>> { %v733_v15 = vpop.permute.xlu1 %732 }
 0x2b6   : >>> { %v745_v16 = vsel %vm744_vm6, %v733_v15, %v741_v14 }
 0x2b7   : >>> { %v751_v17 = vsel %vm1411_vm2, %v745_v16, 0.0 }
 0x2b8   : >>> { %759 = vst [vmem:[%s729_s15] sm:$0xf] %v751_v17 }
 0x2b9   : >>> { %v754_v19 = vpop.permute.xlu1 %753 }
 0x2ba   : >>> { %v758_v21 = vsel %vm757_vm7, %v734_v18, %v754_v19 }
 0x2bb   : >>> { %760 = vst [vmem:[%s730_s24] sm:$0xf] %v758_v21 }
 0x2bd   : >>> { %v765_v23 = vpop.permute.xlu1 %764 }
 0x2be   : >>> { %v777_v24 = vsel %vm744_vm6, %v765_v23, %v773_v22 }
 0x2bf   : >>> { %v795_v25 = vld [vmem:[%s793_s29] ss:$0 sm:$0xff]  ;;  %v1543_v27 = vld [vmem:[%s793_s29 + $0x3] ss:$0 sm:$0xff]  ;;  %v783_v29 = vsel %vm1411_vm2, %v777_v24, 0.0 }
 0x2c0   : >>> { %v1542_v26 = vld [vmem:[%s793_s29 - $0x1] sm:$0xe]  ;;  %791 = vst [vmem:[%s1927_s22] sm:$0xf] %v783_v29  ;;  %s418_s22 = smov (%p474_p9), [#allocation20] }
 0x2c1   : >>> { %v802_v28 = vsel %vm801_vm14, %v795_v25, %v1542_v26  ;;  %v786_v31 = vpop.permute.xlu1 %785 }
 0x2c2   : >>> { %805 = vst [vmem:[%s793_s29] sm:$0xf] %v802_v28  ;;  %v819_v32 = vld [vmem:[%s817_s16] ss:$0 sm:$0xff]  ;;  %v1547_v34 = vld [vmem:[%s817_s16 + $0x3] ss:$0 sm:$0xff]  ;;  %v790_v35 = vsel %vm757_vm7, %v766_v30, %v786_v31 }
 0x2c3   : >>> { %v1546_v33 = vld [vmem:[%s817_s16 - $0x1] sm:$0xe]  ;;  %792 = vst [vmem:[%s1930_s27] sm:$0xf] %v790_v35 }
 0x2c4   : >>> { %v826_v36 = vsel %vm801_vm14, %v819_v32, %v1546_v33 }
 0x2c5   : >>> { %829 = vst [vmem:[%s817_s16] sm:$0xf] %v826_v36 }
 0x2c7   : >>> { %v806_v37 = vld [vmem:[%s794_s30] ss:$0 sm:$0xff]  ;;  %v1545_v38 = vld [vmem:[%s794_s30 + $0x1] sm:$0x7] }
 0x2c8   : >>> { %1544 = vst [vmem:[%s793_s29 + $0x1] sm:$0x1] %v806_v37  ;;  %v814_v39 = vsel %vm813_vm15, %v1543_v27, %v1545_v38 }
 0x2c9   : >>> { %816 = vst [vmem:[%s794_s30] sm:$0xf] %v814_v39 }
 0x2ca   : >>> { %v830_v40 = vld [vmem:[%s818_s21] ss:$0 sm:$0xff]  ;;  %v1549_v41 = vld [vmem:[%s818_s21 + $0x1] sm:$0x7] }
 0x2cb   : >>> { %1548 = vst [vmem:[%s817_s16 + $0x1] sm:$0x1] %v830_v40  ;;  %v838_v42 = vsel %vm813_vm15, %v1547_v34, %v1549_v41 }
 0x2cc   : >>> { %840 = vst [vmem:[%s818_s21] sm:$0xf] %v838_v42  ;;  %476 = sbr.rel (!%p474_p9) target bundleno = 272 (0x110), region = 470 }
 0x2cf   : >> { %v388_v43 = vld [vmem:[%s382_s26] sm:$0xf] (%p474_p9) }
 0x2d0   : >> { %v389_v45 = vsel (%p474_p9), %vm1411_vm2, %v388_v43, 0.0  ;;  %v424_v47 = vld [vmem:[%s418_s22] sm:$0xf] (%p474_p9) }
 0x2d1   : >> { %v390_v49 = vmul.f32 %v389_v45, %v389_v45  ;;  %v425_v51 = vsel %vm1411_vm2, %v424_v47, 0.0 }
 0x2d2   : >> { %v407_v44 = vld [vmem:[%s401_s11] sm:$0xf]  ;;  %v426_v53 = vmul.f32 %v425_v51, %v425_v51 }
 0x2d3   : >> { %v408_v46 = vsel %vm1411_vm2, %v407_v44, 0.0  ;;  %v441_v48 = vld [vmem:[%s435_s14] sm:$0xf]  ;;  %v394_v56 = vsel %vm393_vm8, 0.0, %v390_v49 }
 0x2d4   : >> { %v409_v50 = vmul.f32 %v408_v46, %v408_v46  ;;  %v442_v52 = vsel %vm1411_vm2, %v441_v48, 0.0 }
 0x2d5   : >> { %v443_v55 = vmul.f32 %v442_v52, %v442_v52 }
 0x2d6   : >> { %v411_v54 = vadd.f32 %v409_v50, %v390_v49  ;;  %v410_v57 = vadd.f32 %v409_v50, %v394_v56 }
 0x2d7   : >> { %v447_v60 = vsel %vm446_vm9, 0.0, %v443_v55 }
 0x2d8   : >> { %v428_v58 = vadd.f32 %v426_v53, %v411_v54  ;;  %v427_v59 = vadd.f32 %v426_v53, %v410_v57 }
 0x2da   : >> { %v449_v61 = vadd.f32 %v443_v55, %v428_v58  ;;  %v448_v62 = vadd.f32 %v447_v60, %v427_v59 }
 0x2dc   : >> { %450 = vadd.xlane.f32.xlu0 %v449_v61 }
 0x2e0   : >> { %458 = vadd.xlane.f32.xlu0 %v448_v62 }
 0x365   : >> { %v451_v63 = vpop.xlane.xlu0 %450 }
 0x366   : >> { %v452_v0 = vrot.slane %v451_v63, 4 }
 0x368   : >> { %v453_v1 = vadd.f32 %v452_v0, %v451_v63 }
 0x369   : >> { %v459_v2 = vpop.xlane.xlu0 %458 }
 0x36a   : >> { %v454_v3 = vrot.slane %v453_v1, 2  ;;  %v460_v4 = vrot.slane %v459_v2, 4 }
 0x36c   : >> { %v461_v5 = vadd.f32 %v460_v4, %v459_v2  ;;  %v455_v8 = vadd.f32 %v454_v3, %v453_v1 }
 0x36e   : >> { %v462_v9 = vrot.slane %v461_v5, 2  ;;  %v456_v11 = vrot.slane %v455_v8, 1 }
 0x370   : >> { %v463_v10 = vadd.f32 %v462_v9, %v461_v5  ;;  %v457_v14 = vadd.f32 %v456_v11, %v455_v8 }
 0x372   : >> { %v464_v12 = vrot.slane %v463_v10, 1 }
 0x374   : >> { %v465_v13 = vadd.f32 %v464_v12, %v463_v10 }
 0x376   : >> { %1576 = vpush %v465_v13 }
 0x377   : >> { %1578 = vpush %v457_v14 }
 0x3a7   : >> { %s1577_s20 = spop %1576 }
 0x3a8   : >> { %s1579_s15 = spop %1578 }
 0x3a9   : >> { %s468_s24 = smul.f32 1e-10, %s1579_s15 }
 0x3ab   : >> { %p469_p11 = scmp.le.f32.partialorder %s1577_s20, %s468_s24 }
 0x3ad   : >> { %p471_p12 = por %p470_p10, %p469_p11 }
 0x3af   : > { %919 = sbr.rel (!%p471_p12) target bundleno = 271 (0x10f), region = 481 }
 0x3b4 PF: > { %s924_s23 = smov [#allocation18]  ;;  %v928_v6 = vmov %v1781_v6  ;;  %v931_v7 = vmov %v1783_v7  ;;  %v968_v15 = vld [vmem:[#allocation10] sm:$0xf]  ;;  %v976_v16 = vld [vmem:[#allocation12] sm:$0xf]  ;;  %s2064_s17 = scalar_lea.vmem [#allocation11], %s1777_s28 }
 0x3b5   : > { %v948_v6 = vmov %v1781_v6  ;;  %v951_v7 = vmov %v1783_v7  ;;  %v932_v17 = vld [vmem:[%s924_s23] sm:$0xf]  ;;  %vm935_vm10 = vcmp.eq.s32.totalorder %v931_v7, %v928_v6  ;;  %971 = vst [vmem:[%s2064_s17] sm:$0xf] %v968_v15  ;;  %s2065_s27 = scalar_lea.vmem [#allocation13], %s1777_s28  ;;  %v992_v19 = vld [vmem:[#allocation16] sm:$0xf] }
 0x3b6   : > { %vm955_vm11 = vcmp.eq.s32.totalorder %v951_v7, %v948_v6  ;;  %979 = vst [vmem:[%s2065_s27] sm:$0xf] %v976_v16  ;;  %v984_v18 = vld [vmem:[#allocation14] sm:$0xf]  ;;  %v936_v20 = vsel %vm935_vm10, %v932_v17, 0.0  ;;  %s944_s29 = smov [#allocation21]  ;;  %s2066_s16 = scalar_lea.vmem [#allocation15], %s1777_s28 }
 0x3b7   : > { %987 = vst [vmem:[%s2066_s16] sm:$0xf] %v984_v18  ;;  %s2067_s30 = scalar_lea.vmem [#allocation17], %s1777_s28  ;;  %v937_v21 = vrot.slane %v936_v20, 4  ;;  %v952_v22 = vld [vmem:[%s944_s29] sm:$0xf]  ;;  %s920_s21 = sand.u32 7, %s1740_s12  }
 0x3b8   : > { %995 = vst [vmem:[%s2067_s30] sm:$0xf] %v992_v19  ;;  %v956_v23 = vsel %vm955_vm11, %v952_v22, 0.0  ;;  %s2068_s25 = scalar_lea.vmem [#allocation8], %s1779_s18  ;;  %s2069_s11 = scalar_lea.vmem [#allocation9], %s1779_s18 }
 0x3b9   : > { %v938_v24 = vadd.f32 %v937_v21, %v936_v20  ;;  %v957_v25 = vrot.slane %v956_v23, 4  ;;  %s921_s26 = scalar_lea.vmem %s2068_s25, %s920_s21 [#allocation8]  ;;  %s923_s22 = scalar_lea.vmem %s2069_s11, %s920_s21 [#allocation9] }
 0x3ba   : > { %s925_s26 = smov %s921_s26  ;;  %s945_s22 = smov %s923_s22 }
 0x3bb   : > { %v939_v6 = vrot.slane %v938_v24, 2  ;;  %v958_v7 = vadd.f32 %v957_v25, %v956_v23  ;;  %s1023_s14 = sshrl.u32 (%p1754_p3), %s1740_s12, 3  ;;  %s2070_s20 = scalar_lea.vmem (%p1754_p3), [#allocation8], %s1779_s18 }
 0x3bc   : > { %s1564_s15 = sshll.u32 (%p1754_p3), %s1023_s14, 3 }
 0x3bd   : > { %v940_v26 = vadd.f32 %v939_v6, %v938_v24  ;;  %v959_v27 = vrot.slane %v958_v7, 2  ;;  %s1025_s17 = scalar_lea.vmem (%p1754_p3), %s2055_s4, %s1564_s15 }
 0x3bf   : > { %v941_v28 = vrot.slane %v940_v26, 1  ;;  %v960_v29 = vadd.f32 %v959_v27, %v958_v7 }
 0x3c1   : > { %v942_v30 = vadd.f32 %v941_v28, %v940_v26  ;;  %v961_v31 = vrot.slane %v960_v29, 1  ;;  %1022 = sbr.rel (!%p1754_p3) target bundleno = 972 (0x3cc), region = 158 }
 0x3c3   : > { %943 = vst [vmem:[%s925_s26] sm:$0x1] %v942_v30  ;;  %v962_v32 = vadd.f32 %v961_v31, %v960_v29 }
 0x3c5   : > { %963 = vst [vmem:[%s945_s22] sm:$0x1] %v962_v32 }
 0x3ca   : > { %v1054_v33 = vld [vmem:[%s2070_s20] sm:$0xff] }
 0x3cb   : > { %1055 = vst [vmem:[%s1025_s17] sm:$0xff] %v1054_v33 }
 0x3cc PF: > { %1061 = sbr.rel (!%p1754_p3) target bundleno = 980 (0x3d4), region = 196  ;;  %s1062_s27 = sshrl.u32 (%p1754_p3), %s1740_s12, 3 }
 0x3cd   : > { %s2071_s29 = scalar_lea.vmem (%p1754_p3), [#allocation9], %s1779_s18  ;;  %s1565_s16 = sshll.u32 (%p1754_p3), %s1062_s27, 3 }
 0x3ce   : > { %s1064_s25 = scalar_lea.vmem (%p1754_p3), %s2056_s5, %s1565_s16 }
 0x3d2   : > { %v1093_v34 = vld [vmem:[%s2071_s29] sm:$0xff] }
 0x3d3   : > { %1094 = vst [vmem:[%s1064_s25] sm:$0xff] %v1093_v34 }
 0x3d4 PF: > { %s1566_s26 = sshll.u32 %s1740_s12, 2  ;;  %s2072_s19 = scalar_lea.vmem [#allocation11], %s1777_s28 }
 0x3d5   : > { %v1116_v35 = vld [vmem:[%s2072_s19] sm:$0xf]  ;;  %s2073_s11 = scalar_lea.vmem [#allocation13], %s1777_s28  ;;  %s1099_s14 = scalar_lea.vmem %s2057_s6, %s1566_s26 }
 0x3d6   : > { %v1151_v36 = vld [vmem:[%s2073_s11] sm:$0xf]  ;;  %s1134_s24 = scalar_lea.vmem %s2058_s7, %s1566_s26  ;;  %s2074_s23 = scalar_lea.vmem [#allocation15], %s1777_s28  ;;  %1117 = vst [vmem:[%s1099_s14] sm:$0xf] %v1116_v35 }
 0x3d7   : > { %v1186_v37 = vld [vmem:[%s2074_s23] sm:$0xf]  ;;  %s2075_s17 = scalar_lea.vmem [#allocation17], %s1777_s28  ;;  %1152 = vst [vmem:[%s1134_s24] sm:$0xf] %v1151_v36  ;;  %s1169_s29 = scalar_lea.vmem %s2059_s8, %s1566_s26 }
 0x3d8   : > { %v1221_v38 = vld [vmem:[%s2075_s17] sm:$0xf]  ;;  %s1204_s21 = scalar_lea.vmem %s2060_s9, %s1566_s26  ;;  %1187 = vst [vmem:[%s1169_s29] sm:$0xf] %v1186_v37 }
 0x3d9   : > { %1222 = vst [vmem:[%s1204_s21] sm:$0xf] %v1221_v38 }
 0x3da PF: > { %s2076_s25 = sld [smem:[#allocation31_spill]]  ;;  %p13_p13 = scmp.ge.s32.totalorder %s1743_s13, 194  }
 0x3db   : > { %s2077_s30 = smov %s1657_s10  ;;  %s2079_s11 = smov %s1743_s13 }
 0x3dc   :  { %15 = sbr.rel (!%p13_p13) target bundleno = 2 (0x2), region = 492 }
 0x3e0   : > { %s2078_s10 = smov %s2076_s25 }

// kernel: shuffled_group_whitening_forward.5
= control target key start
LH: loop header
LB: loop body
LE: loop exit
PB: predicated region body
PF: predicated region fallthrough
CT: control target
= control target key end

     0   :  { %s873_s12 = smov 0   ;;  %s875_s13 = smov 0   ;;  %s1080_s0 = inlined_call_operand.vmem [shape: f32[3,32,512], index: 0, kind: input, shape index: {}]   ;;  %s1081_s1 = inlined_call_operand.vmem [shape: f32[3,2,256,256], index: 1, kind: input, shape index: {}]   ;;  %s1082_s2 = inlined_call_operand.vmem [shape: f32[3,2,1,256], index: 2, kind: input, shape index: {}]   ;;  %s1083_s3 = inlined_call_operand.vmem [shape: f32[3,32,512], index: 3, kind: output, shape index: {}]  }
   0x1   :  { %s877_s14 = smov 0   ;;  %s879_s15 = smov 0  }
   0x2   :  { %s881_s16 = smov 0   ;;  %s883_s17 = smov 0  }
   0x3   :  { %s885_s18 = smov 0  }
   0x4 LB: > { %s28_s19 = sadd.s32 1, %s843_s16  ;;  %s32_s20 = sadd.s32 1, %s847_s17  ;;  %s851_s18 = sphi %s885_s18, %s13_s18   ;;  %s847_s17 = sphi %s883_s17, %s1090_s17   ;;  %s843_s16 = sphi %s881_s16, %s1089_s16   ;;  %s839_s15 = sphi %s879_s15, %s1088_s15   ;;  %s835_s14 = sphi %s877_s14, %s1087_s14   ;;  %s831_s13 = sphi %s875_s13, %s1086_s13   ;;  %s827_s12 = sphi %s873_s12, %s1085_s12  }
   0x5   : > { %p30_p0 = scmp.ge.s32.totalorder %s28_s19, 2  ;;  %s655_s21 = sadd.s32 4294967295, %s851_s18  }
   0x6   : > { %p50_p1 = scmp.ne.s32.totalorder %s831_s13, %s827_s12  ;;  %p51_p2 = scmp.eq.s32.totalorder %s851_s18, 0 }
   0x7   : > { %s1092_s19 = smov (%p30_p0, %s28_s19), 0  ;;  %s1094_s20 = smov (!%p30_p0, %s32_s20), %s847_s17 }
   0x8   : > { %p34_p3 = scmp.ge.s32.totalorder %s1094_s20, 3  ;;  %p140_p4 = scmp.eq.s32.totalorder %s655_s21, 5 }
   0x9   : > { %s39_s22 = ssub.s32 %s843_s16, %s1092_s19  ;;  %p52_p5 = por %p51_p2, %p50_p1 }
   0xa   : > { %s1096_s20 = smov (%p34_p3, %s1094_s20), 0  ;;  %p921_p6 = por %p140_p4, %p50_p1 }
   0xb   : > { %s36_s24 = ssub.s32 %s847_s17, %s1096_s20  ;;  %s43_s26 = sadd.s32 1, %s831_s13 }
   0xc   : > { %s40_s25 = sor.u32 %s39_s22, %s36_s24  ;;  %p658_p8 = scmp.ge.s32.totalorder %s851_s18, 6 }
   0xd   : > { %p41_p7 = scmp.eq.s32.totalorder %s40_s25, 0 }
   0xe   : > { %162 = sbr.rel (%p658_p8) target bundleno = 30 (0x1e), region = 16 }
   0xf   : > { %s929_s27 = scalar_select %p41_p7, %s831_s13, %s43_s26  }
  0x13   : > { %165 = sbr.rel (!%p52_p5) target bundleno = 30 (0x1e), region = 20  ;;  %s167_s28 = sand.u32 (%p52_p5), 1, %s831_s13  }
  0x14   : > { %s660_s29 = sshll.u32 (%p52_p5), %s843_s16, 1  ;;  %s659_s30 = sshll.u32 (%p52_p5), %s167_s28, 6 }
  0x15   : > { %s661_s4 = sshll.u32 (%p52_p5), %s847_s17, 4  ;;  %s169_s10 = scalar_lea.vmem (%p52_p5), [#allocation2], %s659_s30 }
  0x16   : > { %s175_s5 = sadd.s32 (%p52_p5), %s661_s4, %s660_s29 }
  0x17   : > { %s662_s6 = sshll.u32 (%p52_p5), %s175_s5, 3 }
  0x18   : > { %s177_s9 = scalar_lea.vmem %s1080_s0, %s662_s6 }
  0x19   : > { %v190_v0 = vld [vmem:[%s177_s9] sm:$0xff]  ;;  %v192_v1 = vld [vmem:[%s177_s9 + $0x8] sm:$0xff] }
  0x1a   : > { %v194_v2 = vld [vmem:[%s177_s9 + $0x20] sm:$0xff]  ;;  %191 = vst [vmem:[%s169_s10] sm:$0xff] %v190_v0  ;;  %193 = vst [vmem:[%s169_s10 + $0x8] sm:$0xff] %v192_v1  ;;  %v196_v3 = vld [vmem:[%s177_s9 + $0x28] sm:$0xff] }
  0x1b   : > { %195 = vst [vmem:[%s169_s10 + $0x10] sm:$0xff] %v194_v2  ;;  %v198_v4 = vld [vmem:[%s177_s9 + $0x40] sm:$0xff]  ;;  %v200_v5 = vld [vmem:[%s177_s9 + $0x48] sm:$0xff]  ;;  %197 = vst [vmem:[%s169_s10 + $0x18] sm:$0xff] %v196_v3 }
  0x1c   : > { %199 = vst [vmem:[%s169_s10 + $0x20] sm:$0xff] %v198_v4  ;;  %201 = vst [vmem:[%s169_s10 + $0x28] sm:$0xff] %v200_v5  ;;  %v202_v6 = vld [vmem:[%s177_s9 + $0x60] sm:$0xff]  ;;  %v204_v7 = vld [vmem:[%s177_s9 + $0x68] sm:$0xff] }
  0x1d   : > { %203 = vst [vmem:[%s169_s10 + $0x30] sm:$0xff] %v202_v6  ;;  %205 = vst [vmem:[%s169_s10 + $0x38] sm:$0xff] %v204_v7 }
  0x1e PF: > { %p663_p9 = scmp.ge.s32.totalorder %s851_s18, 1  ;;  %p233_p10 = scmp.lt.s32.totalorder %s851_s18, 7 }
  0x20   : > { %p234_p11 = pnand %p663_p9, %p233_p10 }
  0x21   : > { %p281_p12 = scmp.lt.s32.totalorder (!%p234_p11), %s839_s15, 2  ;;  %p283_p13 = scmp.lt.s32.totalorder (!%p234_p11), %s835_s14, 1 }
  0x22   : > { %237 = sbr.rel (%p234_p11) target bundleno = 322 (0x142), region = 51  ;;  %s240_s11 = sand.u32 (!%p234_p11), 1, %s827_s12  }
  0x23   : > { %s945_s25 = sshll.u32 (!%p234_p11), %s240_s11, 6 }
  0x24   : > { %s948_s29 = scalar_lea.vmem (!%p234_p11), [#allocation2], %s945_s25 }
  0x27   : > { %s282_s21 = scalar_select %p281_p12, %s839_s15, 2  ;;  %v301_v8 = vld [vmem:[%s948_s29 + $0x8] sm:$0xff] }
  0x28   : > { %s284_s22 = scalar_select %p283_p13, %s835_s14, 1  ;;  %v305_v9 = vld [vmem:[%s948_s29 + $0x28] sm:$0xff]  ;;  %436 = vmatprep.mubr.f32.mxu0 %v301_v8 }
  0x29   : > { %s667_s24 = sshll.u32 %s282_s21, 7  ;;  %448 = vmatprep.mubr.f32.mxu1 %v305_v9  ;;  %s670_s7 = sshll.u32 %s282_s21, 2 }
  0x2a   : > { %s666_s26 = sshll.u32 %s284_s22, 6  ;;  %s669_s4 = sshll.u32 %s284_s22, 1 }
  0x2b   : > { %s287_s28 = sadd.s32 %s667_s24, %s666_s26  ;;  %s960_s8 = sadd.s32 %s670_s7, %s669_s4 }
  0x2c   : > { %s668_s30 = sshll.u32 %s287_s28, 3  ;;  %s297_s11 = scalar_lea.vmem %s1082_s2, %s960_s8 }
  0x2d   : > { %s955_s6 = scalar_lea.vmem %s1081_s1, %s668_s30  ;;  %s1034_s21 = scalar_lea.vmem [#allocation3], %s945_s25 }
  0x2e   : > { %v339_v10 = vld [vmem:[%s955_s6 + $0xf8] sm:$0xff]  ;;  %v338_v11 = vld [vmem:[%s955_s6 + $0xf0] sm:$0xff]  ;;  %v337_v12 = vld [vmem:[%s955_s6 + $0xe8] sm:$0xff]  ;;  %s672_s22 = sshll.u32 (%p921_p6), %s835_s14, 1  ;;  %s673_s24 = sshll.u32 (%p921_p6), %s839_s15, 4 }
  0x2f   : > { %372 = vmatprep.subr.mxu0 %v339_v10  ;;  %677 = vmatprep.subr.mxu1 %v339_v10  ;;  %v336_v13 = vld [vmem:[%s955_s6 + $0xe0] sm:$0xff]  ;;  %v335_v14 = vld [vmem:[%s955_s6 + $0xd8] sm:$0xff]  ;;  %v334_v15 = vld [vmem:[%s955_s6 + $0xd0] sm:$0xff]  ;;  %s501_s25 = sadd.s32 (%p921_p6), %s673_s24, %s672_s22 }
  0x30   : > { %373 = vmatpush1.msra.mxu0 %v338_v11  ;;  %709 = vmatpush1.msra.mxu1 %v338_v11  ;;  %v333_v16 = vld [vmem:[%s955_s6 + $0xc8] sm:$0xff]  ;;  %v332_v17 = vld [vmem:[%s955_s6 + $0xc0] sm:$0xff]  ;;  %v331_v18 = vld [vmem:[%s955_s6 + $0xb8] sm:$0xff]  ;;  %s674_s23 = sshll.u32 (%p921_p6), %s501_s25, 3 }
  0x31   : > { %374 = vmatprep.subr.mxu0 %v337_v12  ;;  %678 = vmatprep.subr.mxu1 %v337_v12  ;;  %v330_v19 = vld [vmem:[%s955_s6 + $0xb0] sm:$0xff]  ;;  %v329_v20 = vld [vmem:[%s955_s6 + $0xa8] sm:$0xff]  ;;  %v328_v21 = vld [vmem:[%s955_s6 + $0xa0] sm:$0xff] }
  0x32   : > { %375 = vmatpush1.msra.mxu0 %v336_v13  ;;  %710 = vmatpush1.msra.mxu1 %v336_v13  ;;  %v327_v22 = vld [vmem:[%s955_s6 + $0x98] sm:$0xff]  ;;  %v326_v23 = vld [vmem:[%s955_s6 + $0x90] sm:$0xff]  ;;  %v325_v24 = vld [vmem:[%s955_s6 + $0x88] sm:$0xff] }
  0x33   : > { %376 = vmatprep.subr.mxu0 %v335_v14  ;;  %679 = vmatprep.subr.mxu1 %v335_v14  ;;  %v324_v25 = vld [vmem:[%s955_s6 + $0x80] sm:$0xff]  ;;  %v323_v26 = vld [vmem:[%s955_s6 + $0x78] sm:$0xff]  ;;  %v322_v27 = vld [vmem:[%s955_s6 + $0x70] sm:$0xff] }
  0x34   : > { %377 = vmatpush1.msra.mxu0 %v334_v15  ;;  %711 = vmatpush1.msra.mxu1 %v334_v15  ;;  %v321_v28 = vld [vmem:[%s955_s6 + $0x68] sm:$0xff]  ;;  %v320_v29 = vld [vmem:[%s955_s6 + $0x60] sm:$0xff]  ;;  %v319_v30 = vld [vmem:[%s955_s6 + $0x58] sm:$0xff] }
  0x35   : > { %378 = vmatprep.subr.mxu0 %v333_v16  ;;  %680 = vmatprep.subr.mxu1 %v333_v16  ;;  %v318_v31 = vld [vmem:[%s955_s6 + $0x50] sm:$0xff]  ;;  %v317_v32 = vld [vmem:[%s955_s6 + $0x48] sm:$0xff]  ;;  %v316_v33 = vld [vmem:[%s955_s6 + $0x40] sm:$0xff]  ;;  %v463_v16 = vlaneseq }
  0x36   : > { %379 = vmatpush1.msra.mxu0 %v332_v17  ;;  %712 = vmatpush1.msra.mxu1 %v332_v17  ;;  %v315_v34 = vld [vmem:[%s955_s6 + $0x38] sm:$0xff]  ;;  %v314_v35 = vld [vmem:[%s955_s6 + $0x30] sm:$0xff]  ;;  %v313_v36 = vld [vmem:[%s955_s6 + $0x28] sm:$0xff] }
  0x37   : > { %380 = vmatprep.subr.mxu0 %v331_v18  ;;  %681 = vmatprep.subr.mxu1 %v331_v18  ;;  %v312_v37 = vld [vmem:[%s955_s6 + $0x20] sm:$0xff]  ;;  %v311_v38 = vld [vmem:[%s955_s6 + $0x18] sm:$0xff]  ;;  %v310_v39 = vld [vmem:[%s955_s6 + $0x10] sm:$0xff]  ;;  %v464_v17 = vshrl.u32 %v463_v16, 7 }
  0x38   : > { %381 = vmatpush1.msra.mxu0 %v330_v19  ;;  %713 = vmatpush1.msra.mxu1 %v330_v19  ;;  %v309_v40 = vld [vmem:[%s955_s6 + $0x8] sm:$0xff]  ;;  %v308_v41 = vld [vmem:[%s955_s6] sm:$0xff]  ;;  %v371_v42 = vld [vmem:[%s955_s6 + $0x1f8] sm:$0xff] }
  0x39   : > { %382 = vmatprep.subr.mxu0 %v329_v20  ;;  %682 = vmatprep.subr.mxu1 %v329_v20  ;;  %v370_v43 = vld [vmem:[%s955_s6 + $0x1f0] sm:$0xff]  ;;  %v369_v44 = vld [vmem:[%s955_s6 + $0x1e8] sm:$0xff]  ;;  %v368_v45 = vld [vmem:[%s955_s6 + $0x1e0] sm:$0xff]  ;;  %v465_v18 = vsub.s32 0, %v464_v17  ;;  %v469_v20 = vsub.s32 1, %v464_v17 }
  0x3a   : > { %383 = vmatpush1.msra.mxu0 %v328_v21  ;;  %714 = vmatpush1.msra.mxu1 %v328_v21  ;;  %v367_v46 = vld [vmem:[%s955_s6 + $0x1d8] sm:$0xff]  ;;  %v366_v47 = vld [vmem:[%s955_s6 + $0x1d0] sm:$0xff]  ;;  %v365_v48 = vld [vmem:[%s955_s6 + $0x1c8] sm:$0xff] }
  0x3b   : > { %384 = vmatprep.subr.mxu0 %v327_v22  ;;  %683 = vmatprep.subr.mxu1 %v327_v22  ;;  %v364_v49 = vld [vmem:[%s955_s6 + $0x1c0] sm:$0xff]  ;;  %v363_v50 = vld [vmem:[%s955_s6 + $0x1b8] sm:$0xff]  ;;  %v362_v51 = vld [vmem:[%s955_s6 + $0x1b0] sm:$0xff] }
  0x3c   : > { %385 = vmatpush1.msra.mxu0 %v326_v23  ;;  %715 = vmatpush1.msra.mxu1 %v326_v23  ;;  %v361_v52 = vld [vmem:[%s955_s6 + $0x1a8] sm:$0xff]  ;;  %v360_v53 = vld [vmem:[%s955_s6 + $0x1a0] sm:$0xff]  ;;  %v359_v54 = vld [vmem:[%s955_s6 + $0x198] sm:$0xff] }
  0x3d   : > { %386 = vmatprep.subr.mxu0 %v325_v24  ;;  %684 = vmatprep.subr.mxu1 %v325_v24  ;;  %v358_v55 = vld [vmem:[%s955_s6 + $0x190] sm:$0xff]  ;;  %v357_v56 = vld [vmem:[%s955_s6 + $0x188] sm:$0xff]  ;;  %v356_v57 = vld [vmem:[%s955_s6 + $0x180] sm:$0xff] }
  0x3e   : > { %387 = vmatpush1.msra.mxu0 %v324_v25  ;;  %716 = vmatpush1.msra.mxu1 %v324_v25  ;;  %v355_v58 = vld [vmem:[%s955_s6 + $0x178] sm:$0xff]  ;;  %v354_v59 = vld [vmem:[%s955_s6 + $0x170] sm:$0xff]  ;;  %v353_v60 = vld [vmem:[%s955_s6 + $0x168] sm:$0xff] }
  0x3f   : > { %388 = vmatprep.subr.mxu0 %v323_v26  ;;  %685 = vmatprep.subr.mxu1 %v323_v26  ;;  %v352_v61 = vld [vmem:[%s955_s6 + $0x160] sm:$0xff]  ;;  %v351_v62 = vld [vmem:[%s955_s6 + $0x158] sm:$0xff]  ;;  %v350_v63 = vld [vmem:[%s955_s6 + $0x150] sm:$0xff] }
  0x40   : > { %389 = vmatpush1.msra.mxu0 %v322_v27  ;;  %717 = vmatpush1.msra.mxu1 %v322_v27  ;;  %v349_v0 = vld [vmem:[%s955_s6 + $0x148] sm:$0xff]  ;;  %v348_v1 = vld [vmem:[%s955_s6 + $0x140] sm:$0xff]  ;;  %v347_v2 = vld [vmem:[%s955_s6 + $0x138] sm:$0xff] }
  0x41   : > { %390 = vmatprep.subr.mxu0 %v321_v28  ;;  %686 = vmatprep.subr.mxu1 %v321_v28  ;;  %v346_v3 = vld [vmem:[%s955_s6 + $0x130] sm:$0xff]  ;;  %v345_v4 = vld [vmem:[%s955_s6 + $0x128] sm:$0xff]  ;;  %v344_v5 = vld [vmem:[%s955_s6 + $0x120] sm:$0xff] }
  0x42   : > { %391 = vmatpush1.msra.mxu0 %v320_v29  ;;  %718 = vmatpush1.msra.mxu1 %v320_v29  ;;  %v343_v6 = vld [vmem:[%s955_s6 + $0x118] sm:$0xff]  ;;  %v342_v7 = vld [vmem:[%s955_s6 + $0x110] sm:$0xff]  ;;  %v341_v8 = vld [vmem:[%s955_s6 + $0x108] sm:$0xff] }
  0x43   : > { %392 = vmatprep.subr.mxu0 %v319_v30  ;;  %687 = vmatprep.subr.mxu1 %v319_v30  ;;  %v340_v9 = vld [vmem:[%s955_s6 + $0x100] sm:$0xff]  ;;  %v303_v12 = vld [vmem:[%s948_s29 + $0x18] sm:$0xff]  ;;  %v302_v14 = vld [vmem:[%s948_s29 + $0x10] sm:$0xff] }
  0x44   : > { %393 = vmatpush1.msra.mxu0 %v318_v31  ;;  %719 = vmatpush1.msra.mxu1 %v318_v31  ;;  %v300_v10 = vld [vmem:[%s948_s29] sm:$0xff]  ;;  %v307_v13 = vld [vmem:[%s948_s29 + $0x38] sm:$0xff]  ;;  %v306_v15 = vld [vmem:[%s948_s29 + $0x30] sm:$0xff] }
  0x45   : > { %394 = vmatprep.subr.mxu0 %v317_v32  ;;  %688 = vmatprep.subr.mxu1 %v317_v32  ;;  %v304_v11 = vld [vmem:[%s948_s29 + $0x20] sm:$0xff]  ;;  %s503_s29 = scalar_lea.vmem (%p921_p6), %s1083_s3, %s674_s23 }
  0x46   : > { %395 = vmatpush1.msra.mxu0 %v316_v33  ;;  %720 = vmatpush1.msra.mxu1 %v316_v33  ;;  %v461_v19 = vld [vmem:[%s297_s11] sm:$0x3] }
  0x47   : > { %396 = vmatprep.subr.mxu0 %v315_v34  ;;  %689 = vmatprep.subr.mxu1 %v315_v34  ;;  %v466_v21 = vrot.slane %v461_v19, %v465_v18  ;;  %v470_v22 = vrot.slane %v461_v19, %v469_v20 }
  0x48   : > { %397 = vmatpush1.msra.mxu0 %v314_v35  ;;  %721 = vmatpush1.msra.mxu1 %v314_v35 }
  0x49   : > { %398 = vmatprep.subr.mxu0 %v313_v36  ;;  %690 = vmatprep.subr.mxu1 %v313_v36 }
  0x4a   : > { %399 = vmatpush1.msra.mxu0 %v312_v37  ;;  %722 = vmatpush1.msra.mxu1 %v312_v37 }
  0x4b   : > { %400 = vmatprep.subr.mxu0 %v311_v38  ;;  %691 = vmatprep.subr.mxu1 %v311_v38 }
  0x4c   : > { %401 = vmatpush1.msra.mxu0 %v310_v39  ;;  %723 = vmatpush1.msra.mxu1 %v310_v39 }
  0x4d   : > { %402 = vmatprep.subr.mxu0 %v309_v40  ;;  %692 = vmatprep.subr.mxu1 %v309_v40 }
  0x4e   : > { %403 = vmatpush1.msra.mxu0 %v308_v41  ;;  %724 = vmatpush1.msra.mxu1 %v308_v41 }
  0x4f   : > { %404 = vmatprep.subr.mxu0 %v371_v42  ;;  %693 = vmatprep.subr.mxu1 %v371_v42 }
  0x50   : > { %405 = vmatpush2.msra.mxu0 %v370_v43  ;;  %725 = vmatpush2.msra.mxu1 %v370_v43 }
  0x51   : > { %406 = vmatprep.subr.mxu0 %v369_v44  ;;  %694 = vmatprep.subr.mxu1 %v369_v44 }
  0x52   : > { %407 = vmatpush2.msra.mxu0 %v368_v45  ;;  %726 = vmatpush2.msra.mxu1 %v368_v45 }
  0x53   : > { %408 = vmatprep.subr.mxu0 %v367_v46  ;;  %695 = vmatprep.subr.mxu1 %v367_v46 }
  0x54   : > { %409 = vmatpush2.msra.mxu0 %v366_v47  ;;  %727 = vmatpush2.msra.mxu1 %v366_v47 }
  0x55   : > { %410 = vmatprep.subr.mxu0 %v365_v48  ;;  %696 = vmatprep.subr.mxu1 %v365_v48 }
  0x56   : > { %411 = vmatpush2.msra.mxu0 %v364_v49  ;;  %728 = vmatpush2.msra.mxu1 %v364_v49 }
  0x57   : > { %412 = vmatprep.subr.mxu0 %v363_v50  ;;  %697 = vmatprep.subr.mxu1 %v363_v50 }
  0x58   : > { %413 = vmatpush2.msra.mxu0 %v362_v51  ;;  %729 = vmatpush2.msra.mxu1 %v362_v51 }
  0x59   : > { %414 = vmatprep.subr.mxu0 %v361_v52  ;;  %698 = vmatprep.subr.mxu1 %v361_v52 }
  0x5a   : > { %415 = vmatpush2.msra.mxu0 %v360_v53  ;;  %730 = vmatpush2.msra.mxu1 %v360_v53 }
  0x5b   : > { %416 = vmatprep.subr.mxu0 %v359_v54  ;;  %699 = vmatprep.subr.mxu1 %v359_v54 }
  0x5c   : > { %417 = vmatpush2.msra.mxu0 %v358_v55  ;;  %731 = vmatpush2.msra.mxu1 %v358_v55 }
  0x5d   : > { %418 = vmatprep.subr.mxu0 %v357_v56  ;;  %700 = vmatprep.subr.mxu1 %v357_v56 }
  0x5e   : > { %419 = vmatpush2.msra.mxu0 %v356_v57  ;;  %732 = vmatpush2.msra.mxu1 %v356_v57 }
  0x5f   : > { %420 = vmatprep.subr.mxu0 %v355_v58  ;;  %701 = vmatprep.subr.mxu1 %v355_v58 }
  0x60   : > { %421 = vmatpush2.msra.mxu0 %v354_v59  ;;  %733 = vmatpush2.msra.mxu1 %v354_v59 }
  0x61   : > { %422 = vmatprep.subr.mxu0 %v353_v60  ;;  %702 = vmatprep.subr.mxu1 %v353_v60 }
  0x62   : > { %423 = vmatpush2.msra.mxu0 %v352_v61  ;;  %734 = vmatpush2.msra.mxu1 %v352_v61 }
  0x63   : > { %424 = vmatprep.subr.mxu0 %v351_v62  ;;  %703 = vmatprep.subr.mxu1 %v351_v62 }
  0x64   : > { %425 = vmatpush2.msra.mxu0 %v350_v63  ;;  %735 = vmatpush2.msra.mxu1 %v350_v63 }
  0x65   : > { %426 = vmatprep.subr.mxu0 %v349_v0  ;;  %704 = vmatprep.subr.mxu1 %v349_v0 }
  0x66   : > { %427 = vmatpush2.msra.mxu0 %v348_v1  ;;  %736 = vmatpush2.msra.mxu1 %v348_v1 }
  0x67   : > { %428 = vmatprep.subr.mxu0 %v347_v2  ;;  %705 = vmatprep.subr.mxu1 %v347_v2 }
  0x68   : > { %429 = vmatpush2.msra.mxu0 %v346_v3  ;;  %737 = vmatpush2.msra.mxu1 %v346_v3 }
  0x69   : > { %430 = vmatprep.subr.mxu0 %v345_v4  ;;  %706 = vmatprep.subr.mxu1 %v345_v4 }
  0x6a   : > { %431 = vmatpush2.msra.mxu0 %v344_v5  ;;  %738 = vmatpush2.msra.mxu1 %v344_v5 }
  0x6b   : > { %432 = vmatprep.subr.mxu0 %v343_v6  ;;  %707 = vmatprep.subr.mxu1 %v343_v6 }
  0x6c   : > { %433 = vmatpush2.msra.mxu0 %v342_v7  ;;  %739 = vmatpush2.msra.mxu1 %v342_v7 }
  0x6d   : > { %434 = vmatprep.subr.mxu0 %v341_v8  ;;  %708 = vmatprep.subr.mxu1 %v341_v8 }
  0x6e   : > { %435 = vmatpush2.msra.mxu0 %v340_v9  ;;  %740 = vmatpush2.msra.mxu1 %v340_v9 }
  0x6f   : > { %437 = vmatmul.mubr.f32.vlgmr.msra.gmra.mxu0 %v300_v10  ;;  %449 = vmatmul.mubr.f32.vlgmr.msra.gmra.mxu1 %v304_v11 }
  0x70   : > { %442 = vmatprep.mubr.f32.mxu0 %v303_v12  ;;  %454 = vmatprep.mubr.f32.mxu1 %v307_v13 }
  0x73   : > { %443 = vmatmul.mubr.f32.gmra.mxu0 %v302_v14  ;;  %455 = vmatmul.mubr.f32.gmra.mxu1 %v306_v15 }
 0x12f   : > { %v438_v23 = vpop.f32.mrf.mxu0  ;;  %v450_v24 = vpop.f32.mrf.mxu1 }
 0x130   : > { %v473_v25 = vsub.f32 %v438_v23, %v466_v21  ;;  %v477_v26 = vsub.f32 %v450_v24, %v466_v21 }
 0x131   : > { %v440_v27 = vpop.f32.mrf.mxu0  ;;  %v452_v28 = vpop.f32.mrf.mxu1 }
 0x132   : > { %481 = vst [vmem:[%s1034_s21] sm:$0xff] %v473_v25  ;;  %485 = vst [vmem:[%s1034_s21 + $0x20] sm:$0xff] %v477_v26  ;;  %v474_v29 = vsub.f32 %v440_v27, %v470_v22  ;;  %v478_v30 = vsub.f32 %v452_v28, %v470_v22 }
 0x133   : > { %v444_v31 = vpop.f32.mrf.mxu0  ;;  %v456_v32 = vpop.f32.mrf.mxu1 }
 0x134   : > { %482 = vst [vmem:[%s1034_s21 + $0x8] sm:$0xff] %v474_v29  ;;  %486 = vst [vmem:[%s1034_s21 + $0x28] sm:$0xff] %v478_v30  ;;  %v475_v33 = vsub.f32 %v444_v31, %v466_v21  ;;  %v479_v34 = vsub.f32 %v456_v32, %v466_v21  ;;  %495 = sbr.rel (!%p921_p6) target bundleno = 322 (0x142), region = 59 }
 0x135   : > { %v446_v35 = vpop.f32.mrf.mxu0  ;;  %v458_v36 = vpop.f32.mrf.mxu1 }
 0x136   : > { %483 = vst [vmem:[%s1034_s21 + $0x10] sm:$0xff] %v475_v33  ;;  %487 = vst [vmem:[%s1034_s21 + $0x30] sm:$0xff] %v479_v34  ;;  %v476_v37 = vsub.f32 %v446_v35, %v470_v22  ;;  %v480_v38 = vsub.f32 %v458_v36, %v470_v22 }
 0x138   : > { %484 = vst [vmem:[%s1034_s21 + $0x18] sm:$0xff] %v476_v37  ;;  %488 = vst [vmem:[%s1034_s21 + $0x38] sm:$0xff] %v480_v38 }
 0x139   : > { %v516_v39 = vld [vmem:[%s1034_s21] sm:$0xff] }
 0x13a   : > { %v524_v43 = vld [vmem:[%s1034_s21 + $0x20] sm:$0xff]  ;;  %517 = vst [vmem:[%s503_s29] sm:$0xff] %v516_v39 }
 0x13b   : > { %v518_v40 = vld [vmem:[%s1034_s21 + $0x8] sm:$0xff]  ;;  %525 = vst [vmem:[%s503_s29 + $0x40] sm:$0xff] %v524_v43 }
 0x13c   : > { %v526_v44 = vld [vmem:[%s1034_s21 + $0x28] sm:$0xff]  ;;  %519 = vst [vmem:[%s503_s29 + $0x8] sm:$0xff] %v518_v40 }
 0x13d   : > { %v520_v41 = vld [vmem:[%s1034_s21 + $0x10] sm:$0xff]  ;;  %527 = vst [vmem:[%s503_s29 + $0x48] sm:$0xff] %v526_v44 }
 0x13e   : > { %v528_v45 = vld [vmem:[%s1034_s21 + $0x30] sm:$0xff]  ;;  %521 = vst [vmem:[%s503_s29 + $0x20] sm:$0xff] %v520_v41 }
 0x13f   : > { %v522_v42 = vld [vmem:[%s1034_s21 + $0x18] sm:$0xff]  ;;  %529 = vst [vmem:[%s503_s29 + $0x60] sm:$0xff] %v528_v45 }
 0x140   : > { %v530_v46 = vld [vmem:[%s1034_s21 + $0x38] sm:$0xff]  ;;  %523 = vst [vmem:[%s503_s29 + $0x28] sm:$0xff] %v522_v42 }
 0x141   : > { %531 = vst [vmem:[%s503_s29 + $0x68] sm:$0xff] %v530_v46 }
 0x142 PF: > { %s13_s18 = sadd.s32 1, %s851_s18   ;;  %s1085_s12 = smov %s831_s13 }
 0x143   : > { %p10_p0 = scmp.ge.s32.totalorder %s13_s18, 8   ;;  %s1086_s13 = smov %s929_s27 }
 0x144   : > { %s1087_s14 = smov %s843_s16  ;;  %s1088_s15 = smov %s847_s17 }
 0x145   : > { %s1089_s16 = smov %s1092_s19  ;;  %s1090_s17 = smov %s1096_s20 }
 0x146   :  { %12 = sbr.rel (!%p10_p0) target bundleno = 4 (0x4), region = 119 }

</bundles_post_ra>
